<compile_context>
chip_gen: v7x
topology: tpu7x:2x2x1
jax: 0.10.0
libtpu: 0.0.40
codegen_flags: <defaults>
</compile_context>

<pallas_src>
import numpy as np
import jax
import jax.numpy as jnp
from jax.experimental import pallas as pl
from jax.experimental.pallas import tpu as pltpu

NODE_TYPE_SIZE = 9            # common.NodeType.SIZE
HIDDEN = 32
NUM_MP_STEPS = 2
OUT_SIZE = 2                  # velocity update (2D)

NODE_IN = 2 + NODE_TYPE_SIZE  # 11
EDGE_IN = 3
NODE_IN_PAD = 16              # 11 -> 16  (sublane-aligned weight-slab rows)
EDGE_IN_PAD = 8               # 3  -> 8
OUT_PAD = 128                 # lane-dense output block; real data in cols [0, OUT_SIZE)


def _round_up(x, m):
    return (x + m - 1) // m * m


# ----------------------------------------------------------------------------
# packed-parameter layout (shared by the packer in the glue and the kernel)
# ----------------------------------------------------------------------------
def _build_w_layout():
    entries = [("enc_node_w0", NODE_IN_PAD), ("enc_node_w1", HIDDEN),
               ("enc_edge_w0", EDGE_IN_PAD), ("enc_edge_w1", HIDDEN)]
    for s in range(NUM_MP_STEPS):
        entries += [(f"mp{s}_edge_w0e", HIDDEN), (f"mp{s}_edge_w0s", HIDDEN),
                    (f"mp{s}_edge_w0r", HIDDEN), (f"mp{s}_edge_w1", HIDDEN),
                    (f"mp{s}_node_w0n", HIDDEN), (f"mp{s}_node_w0a", HIDDEN),
                    (f"mp{s}_node_w1", HIDDEN)]
    entries += [("dec_w0", HIDDEN)]
    layout, off = {}, 0
    for name, rows in entries:            # every entry is a multiple of 8 rows ->
        layout[name] = (off, rows)        # all in-kernel slab slices are sublane aligned
        off += rows
    return layout, off


def _build_b_layout():
    names = ["enc_node_b0", "enc_node_b1", "enc_edge_b0", "enc_edge_b1"]
    for s in range(NUM_MP_STEPS):
        names += [f"mp{s}_edge_b0", f"mp{s}_edge_b1",
                  f"mp{s}_node_b0", f"mp{s}_node_b1"]
    names += ["dec_b0"]
    return {n: i for i, n in enumerate(names)}, _round_up(len(names), 8)


W_LAYOUT, W_ROWS = _build_w_layout()
B_LAYOUT, B_ROWS = _build_b_layout()


# ----------------------------------------------------------------------------
# shared math (runs inside the Pallas kernel; also reused as a pure-JAX check)
# ----------------------------------------------------------------------------
def _layer_norm(y, eps=1e-5):
    mu = jnp.mean(y, axis=-1, keepdims=True)
    var = jnp.mean(jnp.square(y - mu), axis=-1, keepdims=True)
    return (y - mu) * jax.lax.rsqrt(var + eps)       # rsqrt -> EUP slot, off the VALU


def _forward_math(node_feat, edge_feat, vel_pad, gsr,
                  w_slab, b_slab, w_dec_out, b_dec_out):
    """Encode-Process-Decode on full VMEM-resident blocks.

    Arguments may be Pallas Refs (in-kernel) or jnp arrays (pure-JAX reference):
    `x[...]` loads / is a no-op, and weight-slab slices only load the window they need.
    `gsr` is the [2E, N] bf16 stack of the sender and receiver one-hot matrices.
    """
    f32, bf16 = jnp.float32, jnp.bfloat16
    node_feat, edge_feat, vel_pad = node_feat[...], edge_feat[...], vel_pad[...]
    gsr = gsr[...]
    e_pad = gsr.shape[0] // 2                        # static (trace-time) split point
    gr = gsr[e_pad:]                                 # receiver one-hot; reused for scatter
    w_dec_out, b_dec_out = w_dec_out[...], b_dec_out[...]
    b_all = b_slab[...]                              # tiny [B_ROWS, HIDDEN] slab

    def W(name):                                     # aligned window load from the slab
        off, rows = W_LAYOUT[name]
        return w_slab[off:off + rows, :]

    def B(name):
        i = B_LAYOUT[name]
        return b_all[i:i + 1, :]

    def mlp(parts, b0, w1, b1, layer_norm=True):
        # first layer of dot(concat(parts), W0) expressed as a sum of split matmuls
        h = b0
        for x, w0 in parts:
            h = h + jnp.dot(x, w0, preferred_element_type=f32)
        h = jnp.maximum(h, 0.0)
        y = jnp.dot(h, w1, preferred_element_type=f32) + b1
        return _layer_norm(y) if layer_norm else y

    # ---- encode (node/edge input normalizers are folded into enc_*_w0 / enc_*_b0)
    node_lat = mlp([(node_feat, W("enc_node_w0"))], B("enc_node_b0"),
                   W("enc_node_w1"), B("enc_node_b1"))
    edge_lat = mlp([(edge_feat, W("enc_edge_w0"))], B("enc_edge_b0"),
                   W("enc_edge_w1"), B("enc_edge_b1"))

    # ---- process (message passing); gather/scatter via bf16 one-hot MXU matmuls
    for s in range(NUM_MP_STEPS):
        nl16 = node_lat.astype(bf16)
        # single stacked gather: rows [0, E) are sender latents, [E, 2E) receiver latents
        sr_lat = jnp.dot(gsr, nl16, preferred_element_type=f32)      # [2E, H]
        send_lat = sr_lat[:e_pad]                                    # sublane-aligned
        recv_lat = sr_lat[e_pad:]
        edge_lat = edge_lat + mlp(
            [(edge_lat, W(f"mp{s}_edge_w0e")),
             (send_lat, W(f"mp{s}_edge_w0s")),
             (recv_lat, W(f"mp{s}_edge_w0r"))],
            B(f"mp{s}_edge_b0"), W(f"mp{s}_edge_w1"), B(f"mp{s}_edge_b1"))
        # scatter-sum to receivers: contract gr's edge axis -- no dense [N, E] input
        agg = jax.lax.dot_general(
            gr, edge_lat.astype(bf16),
            dimension_numbers=(((0,), (0,)), ((), ())),
            preferred_element_type=f32)                              # [N, H]
        node_lat = node_lat + mlp(
            [(node_lat, W(f"mp{s}_node_w0n")), (agg, W(f"mp{s}_node_w0a"))],
            B(f"mp{s}_node_b0"), W(f"mp{s}_node_w1"), B(f"mp{s}_node_b1"))

    # ---- decode + _update (output normalizer inverse folded into w_dec_out/b_dec_out)
    h = jnp.maximum(jnp.dot(node_lat, W("dec_w0"), preferred_element_type=f32)
                    + B("dec_b0"), 0.0)
    net_out = jnp.dot(h, w_dec_out, preferred_element_type=f32) + b_dec_out  # [N, 128]
    return vel_pad + net_out           # lane-dense; real output in columns [0, OUT_SIZE)


# ----------------------------------------------------------------------------
# Pallas kernel: whole forward pass on full VMEM-resident blocks (small graph)
# ----------------------------------------------------------------------------
def cfd_kernel(*refs):
    *in_refs, out_ref = refs
    out_ref[...] = _forward_math(*in_refs)


# ----------------------------------------------------------------------------
# glue: graph construction (common.triangles_to_edges equivalent), feature build,
# normalizer folding and weight-slab packing -- all outside the kernel.
# ----------------------------------------------------------------------------
def triangles_to_edges_np(cells):
    c = np.asarray(cells)
    edges = np.concatenate(
        [c[:, 0:2], c[:, 1:3], np.stack([c[:, 2], c[:, 0]], axis=-1)], axis=0)
    lo = edges.min(axis=-1)
    hi = edges.max(axis=-1)
    unique = np.unique(np.stack([lo, hi], axis=-1), axis=0)
    senders = np.concatenate([unique[:, 0], unique[:, 1]]).astype(np.int32)
    receivers = np.concatenate([unique[:, 1], unique[:, 0]]).astype(np.int32)
    return senders, receivers


def _pack_params(weights, normalizers):
    w = list(weights)
    (nmean, nstd), (emean, estd), (omean, ostd) = normalizers

    # fold input normalizers:  ((x - m)/s) @ W0 + b0  ==  x @ (W0/s) + (b0 - (m/s)@W0)
    w0n, b0n, w1n, b1n = w[0:4]
    w0n_f = w0n / nstd[0][:, None]
    b0n_f = b0n - jnp.dot(nmean / nstd, w0n)
    w0e, b0e, w1e, b1e = w[4:8]
    w0e_f = w0e / estd[0][:, None]
    b0e_f = b0e - jnp.dot(emean / estd, w0e)

    # fold output_normalizer.inverse into the decoder last layer; lane-pad to OUT_PAD
    dec_w0, dec_b0, dec_w1, dec_b1 = w[8 + 8 * NUM_MP_STEPS: 12 + 8 * NUM_MP_STEPS]
    w_out = dec_w1 * ostd                                   # [H, OUT_SIZE]
    b_out = dec_b1 * ostd + omean                           # [1, OUT_SIZE]
    w_dec_out = jnp.zeros((HIDDEN, OUT_PAD), jnp.float32).at[:, :OUT_SIZE].set(w_out)
    b_dec_out = jnp.zeros((1, OUT_PAD), jnp.float32).at[:, :OUT_SIZE].set(b_out)

    # pack everything with HIDDEN output columns into two row-aligned slabs
    w_slab = jnp.zeros((W_ROWS, HIDDEN), jnp.float32)
    b_slab = jnp.zeros((B_ROWS, HIDDEN), jnp.float32)

    def put_w(slab, name, mat):
        off, _ = W_LAYOUT[name]
        return slab.at[off:off + mat.shape[0], :].set(mat)

    def put_b(slab, name, vec):
        i = B_LAYOUT[name]
        return slab.at[i:i + 1, :].set(vec)

    w_slab = put_w(w_slab, "enc_node_w0", w0n_f)
    w_slab = put_w(w_slab, "enc_node_w1", w1n)
    w_slab = put_w(w_slab, "enc_edge_w0", w0e_f)
    w_slab = put_w(w_slab, "enc_edge_w1", w1e)
    b_slab = put_b(b_slab, "enc_node_b0", b0n_f)
    b_slab = put_b(b_slab, "enc_node_b1", b1n)
    b_slab = put_b(b_slab, "enc_edge_b0", b0e_f)
    b_slab = put_b(b_slab, "enc_edge_b1", b1e)

    for s in range(NUM_MP_STEPS):
        ew0, eb0, ew1, eb1 = w[8 + 8 * s: 12 + 8 * s]
        nw0, nb0, nw1, nb1 = w[12 + 8 * s: 16 + 8 * s]
        # split the concat-input first-layer weights (concat -> sum of matmuls)
        w_slab = put_w(w_slab, f"mp{s}_edge_w0e", ew0[0 * HIDDEN:1 * HIDDEN])
        w_slab = put_w(w_slab, f"mp{s}_edge_w0s", ew0[1 * HIDDEN:2 * HIDDEN])
        w_slab = put_w(w_slab, f"mp{s}_edge_w0r", ew0[2 * HIDDEN:3 * HIDDEN])
        w_slab = put_w(w_slab, f"mp{s}_edge_w1", ew1)
        w_slab = put_w(w_slab, f"mp{s}_node_w0n", nw0[0 * HIDDEN:1 * HIDDEN])
        w_slab = put_w(w_slab, f"mp{s}_node_w0a", nw0[1 * HIDDEN:2 * HIDDEN])
        w_slab = put_w(w_slab, f"mp{s}_node_w1", nw1)
        b_slab = put_b(b_slab, f"mp{s}_edge_b0", eb0)
        b_slab = put_b(b_slab, f"mp{s}_edge_b1", eb1)
        b_slab = put_b(b_slab, f"mp{s}_node_b0", nb0)
        b_slab = put_b(b_slab, f"mp{s}_node_b1", nb1)

    w_slab = put_w(w_slab, "dec_w0", dec_w0)
    b_slab = put_b(b_slab, "dec_b0", dec_b0)
    return w_slab, b_slab, w_dec_out, b_dec_out


def _prepare_args(inputs, weights, normalizers):
    velocity = jnp.asarray(inputs['velocity'], jnp.float32)
    node_type = jnp.asarray(inputs['node_type'], jnp.int32)          # [N, 1]
    mesh_pos = np.asarray(inputs['mesh_pos'], np.float32)
    n = velocity.shape[0]
    n_pad = _round_up(n, 16)

    senders, receivers = triangles_to_edges_np(inputs['cells'])
    e = senders.shape[0]
    e_pad = _round_up(e, 16)

    # node features: concat(velocity, one_hot(node_type)); normalizer folded into weights
    one_hot = jax.nn.one_hot(node_type[:, 0], NODE_TYPE_SIZE, dtype=jnp.float32)
    node_feat = jnp.concatenate([velocity, one_hot], axis=-1)        # [N, 11]
    node_feat = jnp.pad(node_feat, ((0, n_pad - n), (0, NODE_IN_PAD - NODE_IN)))

    # edge geometry is graph-static: precompute outside the kernel
    rel = mesh_pos[senders] - mesh_pos[receivers]                    # [E, 2]
    rel_norm = np.linalg.norm(rel, axis=-1, keepdims=True)
    edge_feat = np.concatenate([rel, rel_norm], axis=-1).astype(np.float32)
    edge_feat = jnp.asarray(
        np.pad(edge_feat, ((0, e_pad - e), (0, EDGE_IN_PAD - EDGE_IN))))

    # lane-padded velocity for the residual update / lane-dense output store
    vel_pad = jnp.pad(velocity, ((0, n_pad - n), (0, OUT_PAD - OUT_SIZE)))

    # one-hot gather matrices in bf16 (exact; half the VMEM/HBM, 2x MXU throughput),
    # stacked [senders; receivers] along axis 0 so each MP step does one gather matmul
    # and the receiver half doubles as the scatter operand.  Padding rows/cols are all
    # zero, so they do not affect the results.
    gsr = np.zeros((2 * e_pad, n_pad), np.float32)
    gsr[np.arange(e), senders] = 1.0
    gsr[e_pad + np.arange(e), receivers] = 1.0
    gsr = jnp.asarray(gsr, jnp.bfloat16)
    # TODO(synk): the dense boolean adj[receivers, senders] built in _build_graph is not
    # used by this learned model; gather/scatter is done with one-hot matmuls instead.
    # TODO(synk): for non-toy meshes, replace the dense one-hot gather with
    # scalar-prefetched senders/receivers (PrefetchScalarGridSpec) driving a tiled,
    # double-buffered row gather plus a "parallel" node/edge grid for v7x megacore.

    w_slab, b_slab, w_dec_out, b_dec_out = _pack_params(weights, normalizers)
    args = [node_feat, edge_feat, vel_pad, gsr,
            w_slab, b_slab, w_dec_out, b_dec_out]
    return args, n


def model_forward(inputs, weights, normalizers):
    args, n = _prepare_args(inputs, weights, normalizers)
    n_pad = args[0].shape[0]
    out_pad = pl.pallas_call(
        cfd_kernel,
        out_shape=jax.ShapeDtypeStruct((n_pad, OUT_PAD), jnp.float32),
        in_specs=[pl.BlockSpec(memory_space=pltpu.MemorySpace.VMEM)] * len(args),
        out_specs=pl.BlockSpec(memory_space=pltpu.MemorySpace.VMEM),
    )(*args)
    return out_pad[:n, :OUT_SIZE]


# ----------------------------------------------------------------------------
# faithful f32 reference of the original module (explicit normalizers, concats,
# index gathers, segment-sum scatter) -- validates the folding/splitting/one-hot math.
# ----------------------------------------------------------------------------
def reference_forward(inputs, weights, normalizers):
    w = list(weights)
    (nmean, nstd), (emean, estd), (omean, ostd) = normalizers
    vel = jnp.asarray(inputs['velocity'], jnp.float32)
    ntype = jnp.asarray(inputs['node_type'], jnp.int32)
    mesh_pos = jnp.asarray(inputs['mesh_pos'], jnp.float32)
    n = vel.shape[0]
    senders, receivers = triangles_to_edges_np(inputs['cells'])
    senders = jnp.asarray(senders); receivers = jnp.asarray(receivers)

    one_hot = jax.nn.one_hot(ntype[:, 0], NODE_TYPE_SIZE, dtype=jnp.float32)
    node_feat = (jnp.concatenate([vel, one_hot], -1) - nmean) / nstd
    rel = mesh_pos[senders] - mesh_pos[receivers]
    edge_feat = jnp.concatenate(
        [rel, jnp.linalg.norm(rel, axis=-1, keepdims=True)], -1)
    edge_feat = (edge_feat - emean) / estd

    def mlp(x, w0, b0, w1, b1, ln=True):
        h = jnp.maximum(x @ w0 + b0, 0.0)
        y = h @ w1 + b1
        if ln:
            mu = y.mean(-1, keepdims=True)
            var = ((y - mu) ** 2).mean(-1, keepdims=True)
            y = (y - mu) / jnp.sqrt(var + 1e-5)
        return y

    node_lat = mlp(node_feat, *w[0:4])
    edge_lat = mlp(edge_feat, *w[4:8])
    for s in range(NUM_MP_STEPS):
        we = w[8 + 8 * s: 12 + 8 * s]
        wn = w[12 + 8 * s: 16 + 8 * s]
        edge_in = jnp.concatenate(
            [edge_lat, node_lat[senders], node_lat[receivers]], -1)
        edge_lat = edge_lat + mlp(edge_in, *we)
        agg = jax.ops.segment_sum(edge_lat, receivers, num_segments=n)
        node_lat = node_lat + mlp(jnp.concatenate([node_lat, agg], -1), *wn)
    dec = w[8 + 8 * NUM_MP_STEPS:]
    net_out = mlp(node_lat, *dec, ln=False)
    return vel + net_out * ostd + omean


# ----------------------------------------------------------------------------
# deterministic parameter / normalizer initialization
# ----------------------------------------------------------------------------
def init_mlp_weights(key):
    sizes = [(NODE_IN, HIDDEN), (HIDDEN, HIDDEN),        # node encoder
             (EDGE_IN, HIDDEN), (HIDDEN, HIDDEN)]        # edge encoder
    for _ in range(NUM_MP_STEPS):
        sizes += [(3 * HIDDEN, HIDDEN), (HIDDEN, HIDDEN),  # edge update MLP
                  (2 * HIDDEN, HIDDEN), (HIDDEN, HIDDEN)]  # node update MLP
    sizes += [(HIDDEN, HIDDEN), (HIDDEN, OUT_SIZE)]        # decoder
    weights = []
    for (din, dout) in sizes:
        key, kw, kb = jax.random.split(key, 3)
        weights.append(jax.random.normal(kw, (din, dout), jnp.float32) / np.sqrt(din))
        weights.append(0.01 * jax.random.normal(kb, (1, dout), jnp.float32))
    return weights      # flat list [W, b, W, b, ...], 28 arrays


def init_normalizers(key):
    def stats(k, size):
        k1, k2 = jax.random.split(k)
        mean = 0.1 * jax.random.normal(k1, (1, size), jnp.float32)
        std = 1.0 + 0.1 * jnp.abs(jax.random.normal(k2, (1, size), jnp.float32))
        return mean, std
    k1, k2, k3 = jax.random.split(key, 3)
    return (stats(k1, NODE_IN),   # node_normalizer
            stats(k2, EDGE_IN),   # edge_normalizer
            stats(k3, OUT_SIZE))  # output_normalizer


# ----------------------------------------------------------------------------
if __name__ == "__main__":
    key = jax.random.PRNGKey(0)

    # small structured mesh: 4x4 grid of nodes, triangulated quads
    grid = 4
    n = grid * grid
    ys, xs = np.meshgrid(np.arange(grid), np.arange(grid), indexing="ij")
    mesh_pos = np.stack([xs.ravel(), ys.ravel()], axis=-1).astype(np.float32)
    cells = []
    for i in range(grid - 1):
        for j in range(grid - 1):
            a = i * grid + j
            b, c, d = a + 1, a + grid, a + grid + 1
            cells.append([a, b, c])
            cells.append([b, d, c])
    cells = np.asarray(cells, dtype=np.int32)                 # [18, 3]

    k1, k2, k3, k4 = jax.random.split(key, 4)
    inputs = {
        'velocity': jax.random.normal(k1, (n, 2), jnp.float32),
        'node_type': jax.random.randint(k2, (n, 1), 0, NODE_TYPE_SIZE, jnp.int32),
        'mesh_pos': jnp.asarray(mesh_pos),
        'cells': cells,
    }
    weights = init_mlp_weights(k3)
    normalizers = init_normalizers(k4)

    out = jax.block_until_ready(model_forward(inputs, weights, normalizers))
    assert out.shape == (n, OUT_SIZE)

    # 1) same-math pure-JAX check (validates the Pallas lowering of the fused kernel)
    args, _ = _prepare_args(inputs, weights, normalizers)
    same = jax.block_until_ready(_forward_math(*args))[:n, :OUT_SIZE]
    np.testing.assert_allclose(np.asarray(out), np.asarray(same), rtol=1e-2, atol=1e-2)

    # 2) faithful f32 reference of the original module (validates normalizer folding,
    #    concat splitting, one-hot gather/scatter); small delta from bf16 operands.
    ref = jax.block_until_ready(reference_forward(inputs, weights, normalizers))
    np.testing.assert_allclose(np.asarray(out), np.asarray(ref), rtol=5e-2, atol=5e-2)

    print("KERNEL_OK")
</pallas_src>

<mosaic_0001>
module attributes {stable_mosaic.version = 11 : i64} {
  func.func @cfd_kernel(%arg0: memref<16x16xf32, #tpu.memory_space<vmem>>, %arg1: memref<80x8xf32, #tpu.memory_space<vmem>>, %arg2: memref<16x128xf32, #tpu.memory_space<vmem>>, %arg3: memref<160x16xbf16, #tpu.memory_space<vmem>>, %arg4: memref<568x32xf32, #tpu.memory_space<vmem>>, %arg5: memref<16x32xf32, #tpu.memory_space<vmem>>, %arg6: memref<32x128xf32, #tpu.memory_space<vmem>>, %arg7: memref<1x128xf32, #tpu.memory_space<vmem>>, %arg8: memref<16x128xf32, #tpu.memory_space<vmem>>) attributes {dimension_semantics = [], scalar_prefetch = 0 : i64, scratch_operands = 0 : i64, tpu.core_type = #tpu.core_type<tc>} {
    %c0 = arith.constant 0 : index
    %c0_0 = arith.constant 0 : index
    %0 = vector.load %arg0[%c0, %c0_0] : memref<16x16xf32, #tpu.memory_space<vmem>>, vector<16x16xf32>
    %c0_1 = arith.constant 0 : index
    %c0_2 = arith.constant 0 : index
    %1 = vector.load %arg1[%c0_1, %c0_2] : memref<80x8xf32, #tpu.memory_space<vmem>>, vector<80x8xf32>
    %c0_3 = arith.constant 0 : index
    %c0_4 = arith.constant 0 : index
    %2 = vector.load %arg2[%c0_3, %c0_4] : memref<16x128xf32, #tpu.memory_space<vmem>>, vector<16x128xf32>
    %c0_5 = arith.constant 0 : index
    %c0_6 = arith.constant 0 : index
    %3 = vector.load %arg3[%c0_5, %c0_6] : memref<160x16xbf16, #tpu.memory_space<vmem>>, vector<160x16xbf16>
    %4 = vector.extract_strided_slice %3 {offsets = [80, 0], sizes = [80, 16], strides = [1, 1]} : vector<160x16xbf16> to vector<80x16xbf16>
    %c0_7 = arith.constant 0 : index
    %c0_8 = arith.constant 0 : index
    %5 = vector.load %arg6[%c0_7, %c0_8] : memref<32x128xf32, #tpu.memory_space<vmem>>, vector<32x128xf32>
    %c0_9 = arith.constant 0 : index
    %c0_10 = arith.constant 0 : index
    %6 = vector.load %arg7[%c0_9, %c0_10] : memref<1x128xf32, #tpu.memory_space<vmem>>, vector<1x128xf32>
    %c0_11 = arith.constant 0 : index
    %c0_12 = arith.constant 0 : index
    %7 = vector.load %arg5[%c0_11, %c0_12] : memref<16x32xf32, #tpu.memory_space<vmem>>, vector<16x32xf32>
    %c0_13 = arith.constant 0 : index
    %c0_14 = arith.constant 0 : index
    %8 = vector.load %arg4[%c0_13, %c0_14] : memref<568x32xf32, #tpu.memory_space<vmem>>, vector<16x32xf32>
    %9 = vector.extract_strided_slice %7 {offsets = [0, 0], sizes = [1, 32], strides = [1, 1]} : vector<16x32xf32> to vector<1x32xf32>
    %c16 = arith.constant 16 : index
    %c0_15 = arith.constant 0 : index
    %10 = vector.load %arg4[%c16, %c0_15] : memref<568x32xf32, #tpu.memory_space<vmem>>, vector<32x32xf32>
    %11 = vector.extract_strided_slice %7 {offsets = [1, 0], sizes = [1, 32], strides = [1, 1]} : vector<16x32xf32> to vector<1x32xf32>
    %cst = arith.constant dense<0.000000e+00> : vector<16x32xf32>
    %12 = tpu.matmul %0, %8, %cst {dimension_numbers = #tpu.dot_dimension_numbers<[1], [0], [0], [1], [0, 0, 1, 1], [], []>} : vector<16x16xf32>, vector<16x32xf32>, vector<16x32xf32> -> vector<16x32xf32>
    %13 = vector.broadcast %9 : vector<1x32xf32> to vector<16x32xf32>
    %14 = arith.addf %13, %12 : vector<16x32xf32>
    %cst_16 = arith.constant 0.000000e+00 : f32
    %15 = vector.broadcast %cst_16 : f32 to vector<16x32xf32>
    %16 = arith.maximumf %14, %15 : vector<16x32xf32>
    %cst_17 = arith.constant dense<0.000000e+00> : vector<16x32xf32>
    %17 = tpu.matmul %16, %10, %cst_17 {dimension_numbers = #tpu.dot_dimension_numbers<[1], [0], [0], [1], [0, 0, 1, 1], [], []>} : vector<16x32xf32>, vector<32x32xf32>, vector<16x32xf32> -> vector<16x32xf32>
    %18 = vector.broadcast %11 : vector<1x32xf32> to vector<16x32xf32>
    %19 = arith.addf %17, %18 : vector<16x32xf32>
    %cst_18 = arith.constant dense<0.000000e+00> : vector<16xf32>
    %20 = vector.multi_reduction <add>, %19, %cst_18 [1] : vector<16x32xf32> to vector<16xf32>
    %21 = vector.shape_cast %20 : vector<16xf32> to vector<16x1xf32>
    %cst_19 = arith.constant 3.200000e+01 : f32
    %22 = vector.broadcast %cst_19 : f32 to vector<16x1xf32>
    %23 = arith.divf %21, %22 : vector<16x1xf32>
    %24 = vector.broadcast %23 : vector<16x1xf32> to vector<16x32xf32>
    %25 = arith.subf %19, %24 : vector<16x32xf32>
    %26 = arith.mulf %25, %25 : vector<16x32xf32>
    %cst_20 = arith.constant dense<0.000000e+00> : vector<16xf32>
    %27 = vector.multi_reduction <add>, %26, %cst_20 [1] : vector<16x32xf32> to vector<16xf32>
    %28 = vector.shape_cast %27 : vector<16xf32> to vector<16x1xf32>
    %cst_21 = arith.constant 3.200000e+01 : f32
    %29 = vector.broadcast %cst_21 : f32 to vector<16x1xf32>
    %30 = arith.divf %28, %29 : vector<16x1xf32>
    %31 = vector.broadcast %23 : vector<16x1xf32> to vector<16x32xf32>
    %32 = arith.subf %19, %31 : vector<16x32xf32>
    %cst_22 = arith.constant 9.99999974E-6 : f32
    %33 = vector.broadcast %cst_22 : f32 to vector<16x1xf32>
    %34 = arith.addf %30, %33 : vector<16x1xf32>
    %35 = math.rsqrt %34 : vector<16x1xf32>
    %36 = vector.broadcast %35 : vector<16x1xf32> to vector<16x32xf32>
    %37 = arith.mulf %32, %36 : vector<16x32xf32>
    %c48 = arith.constant 48 : index
    %c0_23 = arith.constant 0 : index
    %38 = vector.load %arg4[%c48, %c0_23] : memref<568x32xf32, #tpu.memory_space<vmem>>, vector<8x32xf32>
    %39 = vector.extract_strided_slice %7 {offsets = [2, 0], sizes = [1, 32], strides = [1, 1]} : vector<16x32xf32> to vector<1x32xf32>
    %c56 = arith.constant 56 : index
    %c0_24 = arith.constant 0 : index
    %40 = vector.load %arg4[%c56, %c0_24] : memref<568x32xf32, #tpu.memory_space<vmem>>, vector<32x32xf32>
    %41 = vector.extract_strided_slice %7 {offsets = [3, 0], sizes = [1, 32], strides = [1, 1]} : vector<16x32xf32> to vector<1x32xf32>
    %cst_25 = arith.constant dense<0.000000e+00> : vector<80x32xf32>
    %42 = tpu.matmul %1, %38, %cst_25 {dimension_numbers = #tpu.dot_dimension_numbers<[1], [0], [0], [1], [0, 0, 1, 1], [], []>} : vector<80x8xf32>, vector<8x32xf32>, vector<80x32xf32> -> vector<80x32xf32>
    %43 = vector.broadcast %39 : vector<1x32xf32> to vector<80x32xf32>
    %44 = arith.addf %43, %42 : vector<80x32xf32>
    %cst_26 = arith.constant 0.000000e+00 : f32
    %45 = vector.broadcast %cst_26 : f32 to vector<80x32xf32>
    %46 = arith.maximumf %44, %45 : vector<80x32xf32>
    %cst_27 = arith.constant dense<0.000000e+00> : vector<80x32xf32>
    %47 = tpu.matmul %46, %40, %cst_27 {dimension_numbers = #tpu.dot_dimension_numbers<[1], [0], [0], [1], [0, 0, 1, 1], [], []>} : vector<80x32xf32>, vector<32x32xf32>, vector<80x32xf32> -> vector<80x32xf32>
    %48 = vector.broadcast %41 : vector<1x32xf32> to vector<80x32xf32>
    %49 = arith.addf %47, %48 : vector<80x32xf32>
    %cst_28 = arith.constant dense<0.000000e+00> : vector<80xf32>
    %50 = vector.multi_reduction <add>, %49, %cst_28 [1] : vector<80x32xf32> to vector<80xf32>
    %51 = vector.shape_cast %50 : vector<80xf32> to vector<80x1xf32>
    %cst_29 = arith.constant 3.200000e+01 : f32
    %52 = vector.broadcast %cst_29 : f32 to vector<80x1xf32>
    %53 = arith.divf %51, %52 : vector<80x1xf32>
    %54 = vector.broadcast %53 : vector<80x1xf32> to vector<80x32xf32>
    %55 = arith.subf %49, %54 : vector<80x32xf32>
    %56 = arith.mulf %55, %55 : vector<80x32xf32>
    %cst_30 = arith.constant dense<0.000000e+00> : vector<80xf32>
    %57 = vector.multi_reduction <add>, %56, %cst_30 [1] : vector<80x32xf32> to vector<80xf32>
    %58 = vector.shape_cast %57 : vector<80xf32> to vector<80x1xf32>
    %cst_31 = arith.constant 3.200000e+01 : f32
    %59 = vector.broadcast %cst_31 : f32 to vector<80x1xf32>
    %60 = arith.divf %58, %59 : vector<80x1xf32>
    %61 = vector.broadcast %53 : vector<80x1xf32> to vector<80x32xf32>
    %62 = arith.subf %49, %61 : vector<80x32xf32>
    %cst_32 = arith.constant 9.99999974E-6 : f32
    %63 = vector.broadcast %cst_32 : f32 to vector<80x1xf32>
    %64 = arith.addf %60, %63 : vector<80x1xf32>
    %65 = math.rsqrt %64 : vector<80x1xf32>
    %66 = vector.broadcast %65 : vector<80x1xf32> to vector<80x32xf32>
    %67 = arith.mulf %62, %66 : vector<80x32xf32>
    %68 = arith.truncf %37 : vector<16x32xf32> to vector<16x32xbf16>
    %cst_33 = arith.constant dense<0.000000e+00> : vector<160x32xf32>
    %69 = tpu.matmul %3, %68, %cst_33 {dimension_numbers = #tpu.dot_dimension_numbers<[1], [0], [0], [1], [0, 0, 1, 1], [], []>} : vector<160x16xbf16>, vector<16x32xbf16>, vector<160x32xf32> -> vector<160x32xf32>
    %70 = vector.extract_strided_slice %69 {offsets = [0, 0], sizes = [80, 32], strides = [1, 1]} : vector<160x32xf32> to vector<80x32xf32>
    %71 = vector.extract_strided_slice %69 {offsets = [80, 0], sizes = [80, 32], strides = [1, 1]} : vector<160x32xf32> to vector<80x32xf32>
    %c88 = arith.constant 88 : index
    %c0_34 = arith.constant 0 : index
    %72 = vector.load %arg4[%c88, %c0_34] : memref<568x32xf32, #tpu.memory_space<vmem>>, vector<32x32xf32>
    %c120 = arith.constant 120 : index
    %c0_35 = arith.constant 0 : index
    %73 = vector.load %arg4[%c120, %c0_35] : memref<568x32xf32, #tpu.memory_space<vmem>>, vector<32x32xf32>
    %c152 = arith.constant 152 : index
    %c0_36 = arith.constant 0 : index
    %74 = vector.load %arg4[%c152, %c0_36] : memref<568x32xf32, #tpu.memory_space<vmem>>, vector<32x32xf32>
    %75 = vector.extract_strided_slice %7 {offsets = [4, 0], sizes = [1, 32], strides = [1, 1]} : vector<16x32xf32> to vector<1x32xf32>
    %c184 = arith.constant 184 : index
    %c0_37 = arith.constant 0 : index
    %76 = vector.load %arg4[%c184, %c0_37] : memref<568x32xf32, #tpu.memory_space<vmem>>, vector<32x32xf32>
    %77 = vector.extract_strided_slice %7 {offsets = [5, 0], sizes = [1, 32], strides = [1, 1]} : vector<16x32xf32> to vector<1x32xf32>
    %cst_38 = arith.constant dense<0.000000e+00> : vector<80x32xf32>
    %78 = tpu.matmul %67, %72, %cst_38 {dimension_numbers = #tpu.dot_dimension_numbers<[1], [0], [0], [1], [0, 0, 1, 1], [], []>} : vector<80x32xf32>, vector<32x32xf32>, vector<80x32xf32> -> vector<80x32xf32>
    %79 = vector.broadcast %75 : vector<1x32xf32> to vector<80x32xf32>
    %80 = arith.addf %79, %78 : vector<80x32xf32>
    %cst_39 = arith.constant dense<0.000000e+00> : vector<80x32xf32>
    %81 = tpu.matmul %70, %73, %cst_39 {dimension_numbers = #tpu.dot_dimension_numbers<[1], [0], [0], [1], [0, 0, 1, 1], [], []>} : vector<80x32xf32>, vector<32x32xf32>, vector<80x32xf32> -> vector<80x32xf32>
    %82 = arith.addf %80, %81 : vector<80x32xf32>
    %cst_40 = arith.constant dense<0.000000e+00> : vector<80x32xf32>
    %83 = tpu.matmul %71, %74, %cst_40 {dimension_numbers = #tpu.dot_dimension_numbers<[1], [0], [0], [1], [0, 0, 1, 1], [], []>} : vector<80x32xf32>, vector<32x32xf32>, vector<80x32xf32> -> vector<80x32xf32>
    %84 = arith.addf %82, %83 : vector<80x32xf32>
    %cst_41 = arith.constant 0.000000e+00 : f32
    %85 = vector.broadcast %cst_41 : f32 to vector<80x32xf32>
    %86 = arith.maximumf %84, %85 : vector<80x32xf32>
    %cst_42 = arith.constant dense<0.000000e+00> : vector<80x32xf32>
    %87 = tpu.matmul %86, %76, %cst_42 {dimension_numbers = #tpu.dot_dimension_numbers<[1], [0], [0], [1], [0, 0, 1, 1], [], []>} : vector<80x32xf32>, vector<32x32xf32>, vector<80x32xf32> -> vector<80x32xf32>
    %88 = vector.broadcast %77 : vector<1x32xf32> to vector<80x32xf32>
    %89 = arith.addf %87, %88 : vector<80x32xf32>
    %cst_43 = arith.constant dense<0.000000e+00> : vector<80xf32>
    %90 = vector.multi_reduction <add>, %89, %cst_43 [1] : vector<80x32xf32> to vector<80xf32>
    %91 = vector.shape_cast %90 : vector<80xf32> to vector<80x1xf32>
    %cst_44 = arith.constant 3.200000e+01 : f32
    %92 = vector.broadcast %cst_44 : f32 to vector<80x1xf32>
    %93 = arith.divf %91, %92 : vector<80x1xf32>
    %94 = vector.broadcast %93 : vector<80x1xf32> to vector<80x32xf32>
    %95 = arith.subf %89, %94 : vector<80x32xf32>
    %96 = arith.mulf %95, %95 : vector<80x32xf32>
    %cst_45 = arith.constant dense<0.000000e+00> : vector<80xf32>
    %97 = vector.multi_reduction <add>, %96, %cst_45 [1] : vector<80x32xf32> to vector<80xf32>
    %98 = vector.shape_cast %97 : vector<80xf32> to vector<80x1xf32>
    %cst_46 = arith.constant 3.200000e+01 : f32
    %99 = vector.broadcast %cst_46 : f32 to vector<80x1xf32>
    %100 = arith.divf %98, %99 : vector<80x1xf32>
    %101 = vector.broadcast %93 : vector<80x1xf32> to vector<80x32xf32>
    %102 = arith.subf %89, %101 : vector<80x32xf32>
    %cst_47 = arith.constant 9.99999974E-6 : f32
    %103 = vector.broadcast %cst_47 : f32 to vector<80x1xf32>
    %104 = arith.addf %100, %103 : vector<80x1xf32>
    %105 = math.rsqrt %104 : vector<80x1xf32>
    %106 = vector.broadcast %105 : vector<80x1xf32> to vector<80x32xf32>
    %107 = arith.mulf %102, %106 : vector<80x32xf32>
    %108 = arith.addf %67, %107 : vector<80x32xf32>
    %109 = arith.truncf %108 : vector<80x32xf32> to vector<80x32xbf16>
    %cst_48 = arith.constant dense<0.000000e+00> : vector<16x32xf32>
    %110 = tpu.matmul %4, %109, %cst_48 {dimension_numbers = #tpu.dot_dimension_numbers<[0], [0], [1], [1], [0, 1, 1, 1], [], []>} : vector<80x16xbf16>, vector<80x32xbf16>, vector<16x32xf32> -> vector<16x32xf32>
    %c216 = arith.constant 216 : index
    %c0_49 = arith.constant 0 : index
    %111 = vector.load %arg4[%c216, %c0_49] : memref<568x32xf32, #tpu.memory_space<vmem>>, vector<32x32xf32>
    %c248 = arith.constant 248 : index
    %c0_50 = arith.constant 0 : index
    %112 = vector.load %arg4[%c248, %c0_50] : memref<568x32xf32, #tpu.memory_space<vmem>>, vector<32x32xf32>
    %113 = vector.extract_strided_slice %7 {offsets = [6, 0], sizes = [1, 32], strides = [1, 1]} : vector<16x32xf32> to vector<1x32xf32>
    %c280 = arith.constant 280 : index
    %c0_51 = arith.constant 0 : index
    %114 = vector.load %arg4[%c280, %c0_51] : memref<568x32xf32, #tpu.memory_space<vmem>>, vector<32x32xf32>
    %115 = vector.extract_strided_slice %7 {offsets = [7, 0], sizes = [1, 32], strides = [1, 1]} : vector<16x32xf32> to vector<1x32xf32>
    %cst_52 = arith.constant dense<0.000000e+00> : vector<16x32xf32>
    %116 = tpu.matmul %37, %111, %cst_52 {dimension_numbers = #tpu.dot_dimension_numbers<[1], [0], [0], [1], [0, 0, 1, 1], [], []>} : vector<16x32xf32>, vector<32x32xf32>, vector<16x32xf32> -> vector<16x32xf32>
    %117 = vector.broadcast %113 : vector<1x32xf32> to vector<16x32xf32>
    %118 = arith.addf %117, %116 : vector<16x32xf32>
    %cst_53 = arith.constant dense<0.000000e+00> : vector<16x32xf32>
    %119 = tpu.matmul %110, %112, %cst_53 {dimension_numbers = #tpu.dot_dimension_numbers<[1], [0], [0], [1], [0, 0, 1, 1], [], []>} : vector<16x32xf32>, vector<32x32xf32>, vector<16x32xf32> -> vector<16x32xf32>
    %120 = arith.addf %118, %119 : vector<16x32xf32>
    %cst_54 = arith.constant 0.000000e+00 : f32
    %121 = vector.broadcast %cst_54 : f32 to vector<16x32xf32>
    %122 = arith.maximumf %120, %121 : vector<16x32xf32>
    %cst_55 = arith.constant dense<0.000000e+00> : vector<16x32xf32>
    %123 = tpu.matmul %122, %114, %cst_55 {dimension_numbers = #tpu.dot_dimension_numbers<[1], [0], [0], [1], [0, 0, 1, 1], [], []>} : vector<16x32xf32>, vector<32x32xf32>, vector<16x32xf32> -> vector<16x32xf32>
    %124 = vector.broadcast %115 : vector<1x32xf32> to vector<16x32xf32>
    %125 = arith.addf %123, %124 : vector<16x32xf32>
    %cst_56 = arith.constant dense<0.000000e+00> : vector<16xf32>
    %126 = vector.multi_reduction <add>, %125, %cst_56 [1] : vector<16x32xf32> to vector<16xf32>
    %127 = vector.shape_cast %126 : vector<16xf32> to vector<16x1xf32>
    %cst_57 = arith.constant 3.200000e+01 : f32
    %128 = vector.broadcast %cst_57 : f32 to vector<16x1xf32>
    %129 = arith.divf %127, %128 : vector<16x1xf32>
    %130 = vector.broadcast %129 : vector<16x1xf32> to vector<16x32xf32>
    %131 = arith.subf %125, %130 : vector<16x32xf32>
    %132 = arith.mulf %131, %131 : vector<16x32xf32>
    %cst_58 = arith.constant dense<0.000000e+00> : vector<16xf32>
    %133 = vector.multi_reduction <add>, %132, %cst_58 [1] : vector<16x32xf32> to vector<16xf32>
    %134 = vector.shape_cast %133 : vector<16xf32> to vector<16x1xf32>
    %cst_59 = arith.constant 3.200000e+01 : f32
    %135 = vector.broadcast %cst_59 : f32 to vector<16x1xf32>
    %136 = arith.divf %134, %135 : vector<16x1xf32>
    %137 = vector.broadcast %129 : vector<16x1xf32> to vector<16x32xf32>
    %138 = arith.subf %125, %137 : vector<16x32xf32>
    %cst_60 = arith.constant 9.99999974E-6 : f32
    %139 = vector.broadcast %cst_60 : f32 to vector<16x1xf32>
    %140 = arith.addf %136, %139 : vector<16x1xf32>
    %141 = math.rsqrt %140 : vector<16x1xf32>
    %142 = vector.broadcast %141 : vector<16x1xf32> to vector<16x32xf32>
    %143 = arith.mulf %138, %142 : vector<16x32xf32>
    %144 = arith.addf %37, %143 : vector<16x32xf32>
    %145 = arith.truncf %144 : vector<16x32xf32> to vector<16x32xbf16>
    %cst_61 = arith.constant dense<0.000000e+00> : vector<160x32xf32>
    %146 = tpu.matmul %3, %145, %cst_61 {dimension_numbers = #tpu.dot_dimension_numbers<[1], [0], [0], [1], [0, 0, 1, 1], [], []>} : vector<160x16xbf16>, vector<16x32xbf16>, vector<160x32xf32> -> vector<160x32xf32>
    %147 = vector.extract_strided_slice %146 {offsets = [0, 0], sizes = [80, 32], strides = [1, 1]} : vector<160x32xf32> to vector<80x32xf32>
    %148 = vector.extract_strided_slice %146 {offsets = [80, 0], sizes = [80, 32], strides = [1, 1]} : vector<160x32xf32> to vector<80x32xf32>
    %c312 = arith.constant 312 : index
    %c0_62 = arith.constant 0 : index
    %149 = vector.load %arg4[%c312, %c0_62] : memref<568x32xf32, #tpu.memory_space<vmem>>, vector<32x32xf32>
    %c344 = arith.constant 344 : index
    %c0_63 = arith.constant 0 : index
    %150 = vector.load %arg4[%c344, %c0_63] : memref<568x32xf32, #tpu.memory_space<vmem>>, vector<32x32xf32>
    %c376 = arith.constant 376 : index
    %c0_64 = arith.constant 0 : index
    %151 = vector.load %arg4[%c376, %c0_64] : memref<568x32xf32, #tpu.memory_space<vmem>>, vector<32x32xf32>
    %152 = vector.extract_strided_slice %7 {offsets = [8, 0], sizes = [1, 32], strides = [1, 1]} : vector<16x32xf32> to vector<1x32xf32>
    %c408 = arith.constant 408 : index
    %c0_65 = arith.constant 0 : index
    %153 = vector.load %arg4[%c408, %c0_65] : memref<568x32xf32, #tpu.memory_space<vmem>>, vector<32x32xf32>
    %154 = vector.extract_strided_slice %7 {offsets = [9, 0], sizes = [1, 32], strides = [1, 1]} : vector<16x32xf32> to vector<1x32xf32>
    %cst_66 = arith.constant dense<0.000000e+00> : vector<80x32xf32>
    %155 = tpu.matmul %108, %149, %cst_66 {dimension_numbers = #tpu.dot_dimension_numbers<[1], [0], [0], [1], [0, 0, 1, 1], [], []>} : vector<80x32xf32>, vector<32x32xf32>, vector<80x32xf32> -> vector<80x32xf32>
    %156 = vector.broadcast %152 : vector<1x32xf32> to vector<80x32xf32>
    %157 = arith.addf %156, %155 : vector<80x32xf32>
    %cst_67 = arith.constant dense<0.000000e+00> : vector<80x32xf32>
    %158 = tpu.matmul %147, %150, %cst_67 {dimension_numbers = #tpu.dot_dimension_numbers<[1], [0], [0], [1], [0, 0, 1, 1], [], []>} : vector<80x32xf32>, vector<32x32xf32>, vector<80x32xf32> -> vector<80x32xf32>
    %159 = arith.addf %157, %158 : vector<80x32xf32>
    %cst_68 = arith.constant dense<0.000000e+00> : vector<80x32xf32>
    %160 = tpu.matmul %148, %151, %cst_68 {dimension_numbers = #tpu.dot_dimension_numbers<[1], [0], [0], [1], [0, 0, 1, 1], [], []>} : vector<80x32xf32>, vector<32x32xf32>, vector<80x32xf32> -> vector<80x32xf32>
    %161 = arith.addf %159, %160 : vector<80x32xf32>
    %cst_69 = arith.constant 0.000000e+00 : f32
    %162 = vector.broadcast %cst_69 : f32 to vector<80x32xf32>
    %163 = arith.maximumf %161, %162 : vector<80x32xf32>
    %cst_70 = arith.constant dense<0.000000e+00> : vector<80x32xf32>
    %164 = tpu.matmul %163, %153, %cst_70 {dimension_numbers = #tpu.dot_dimension_numbers<[1], [0], [0], [1], [0, 0, 1, 1], [], []>} : vector<80x32xf32>, vector<32x32xf32>, vector<80x32xf32> -> vector<80x32xf32>
    %165 = vector.broadcast %154 : vector<1x32xf32> to vector<80x32xf32>
    %166 = arith.addf %164, %165 : vector<80x32xf32>
    %cst_71 = arith.constant dense<0.000000e+00> : vector<80xf32>
    %167 = vector.multi_reduction <add>, %166, %cst_71 [1] : vector<80x32xf32> to vector<80xf32>
    %168 = vector.shape_cast %167 : vector<80xf32> to vector<80x1xf32>
    %cst_72 = arith.constant 3.200000e+01 : f32
    %169 = vector.broadcast %cst_72 : f32 to vector<80x1xf32>
    %170 = arith.divf %168, %169 : vector<80x1xf32>
    %171 = vector.broadcast %170 : vector<80x1xf32> to vector<80x32xf32>
    %172 = arith.subf %166, %171 : vector<80x32xf32>
    %173 = arith.mulf %172, %172 : vector<80x32xf32>
    %cst_73 = arith.constant dense<0.000000e+00> : vector<80xf32>
    %174 = vector.multi_reduction <add>, %173, %cst_73 [1] : vector<80x32xf32> to vector<80xf32>
    %175 = vector.shape_cast %174 : vector<80xf32> to vector<80x1xf32>
    %cst_74 = arith.constant 3.200000e+01 : f32
    %176 = vector.broadcast %cst_74 : f32 to vector<80x1xf32>
    %177 = arith.divf %175, %176 : vector<80x1xf32>
    %178 = vector.broadcast %170 : vector<80x1xf32> to vector<80x32xf32>
    %179 = arith.subf %166, %178 : vector<80x32xf32>
    %cst_75 = arith.constant 9.99999974E-6 : f32
    %180 = vector.broadcast %cst_75 : f32 to vector<80x1xf32>
    %181 = arith.addf %177, %180 : vector<80x1xf32>
    %182 = math.rsqrt %181 : vector<80x1xf32>
    %183 = vector.broadcast %182 : vector<80x1xf32> to vector<80x32xf32>
    %184 = arith.mulf %179, %183 : vector<80x32xf32>
    %185 = arith.addf %108, %184 : vector<80x32xf32>
    %186 = arith.truncf %185 : vector<80x32xf32> to vector<80x32xbf16>
    %cst_76 = arith.constant dense<0.000000e+00> : vector<16x32xf32>
    %187 = tpu.matmul %4, %186, %cst_76 {dimension_numbers = #tpu.dot_dimension_numbers<[0], [0], [1], [1], [0, 1, 1, 1], [], []>} : vector<80x16xbf16>, vector<80x32xbf16>, vector<16x32xf32> -> vector<16x32xf32>
    %c440 = arith.constant 440 : index
    %c0_77 = arith.constant 0 : index
    %188 = vector.load %arg4[%c440, %c0_77] : memref<568x32xf32, #tpu.memory_space<vmem>>, vector<32x32xf32>
    %c472 = arith.constant 472 : index
    %c0_78 = arith.constant 0 : index
    %189 = vector.load %arg4[%c472, %c0_78] : memref<568x32xf32, #tpu.memory_space<vmem>>, vector<32x32xf32>
    %190 = vector.extract_strided_slice %7 {offsets = [10, 0], sizes = [1, 32], strides = [1, 1]} : vector<16x32xf32> to vector<1x32xf32>
    %c504 = arith.constant 504 : index
    %c0_79 = arith.constant 0 : index
    %191 = vector.load %arg4[%c504, %c0_79] : memref<568x32xf32, #tpu.memory_space<vmem>>, vector<32x32xf32>
    %192 = vector.extract_strided_slice %7 {offsets = [11, 0], sizes = [1, 32], strides = [1, 1]} : vector<16x32xf32> to vector<1x32xf32>
    %cst_80 = arith.constant dense<0.000000e+00> : vector<16x32xf32>
    %193 = tpu.matmul %144, %188, %cst_80 {dimension_numbers = #tpu.dot_dimension_numbers<[1], [0], [0], [1], [0, 0, 1, 1], [], []>} : vector<16x32xf32>, vector<32x32xf32>, vector<16x32xf32> -> vector<16x32xf32>
    %194 = vector.broadcast %190 : vector<1x32xf32> to vector<16x32xf32>
    %195 = arith.addf %194, %193 : vector<16x32xf32>
    %cst_81 = arith.constant dense<0.000000e+00> : vector<16x32xf32>
    %196 = tpu.matmul %187, %189, %cst_81 {dimension_numbers = #tpu.dot_dimension_numbers<[1], [0], [0], [1], [0, 0, 1, 1], [], []>} : vector<16x32xf32>, vector<32x32xf32>, vector<16x32xf32> -> vector<16x32xf32>
    %197 = arith.addf %195, %196 : vector<16x32xf32>
    %cst_82 = arith.constant 0.000000e+00 : f32
    %198 = vector.broadcast %cst_82 : f32 to vector<16x32xf32>
    %199 = arith.maximumf %197, %198 : vector<16x32xf32>
    %cst_83 = arith.constant dense<0.000000e+00> : vector<16x32xf32>
    %200 = tpu.matmul %199, %191, %cst_83 {dimension_numbers = #tpu.dot_dimension_numbers<[1], [0], [0], [1], [0, 0, 1, 1], [], []>} : vector<16x32xf32>, vector<32x32xf32>, vector<16x32xf32> -> vector<16x32xf32>
    %201 = vector.broadcast %192 : vector<1x32xf32> to vector<16x32xf32>
    %202 = arith.addf %200, %201 : vector<16x32xf32>
    %cst_84 = arith.constant dense<0.000000e+00> : vector<16xf32>
    %203 = vector.multi_reduction <add>, %202, %cst_84 [1] : vector<16x32xf32> to vector<16xf32>
    %204 = vector.shape_cast %203 : vector<16xf32> to vector<16x1xf32>
    %cst_85 = arith.constant 3.200000e+01 : f32
    %205 = vector.broadcast %cst_85 : f32 to vector<16x1xf32>
    %206 = arith.divf %204, %205 : vector<16x1xf32>
    %207 = vector.broadcast %206 : vector<16x1xf32> to vector<16x32xf32>
    %208 = arith.subf %202, %207 : vector<16x32xf32>
    %209 = arith.mulf %208, %208 : vector<16x32xf32>
    %cst_86 = arith.constant dense<0.000000e+00> : vector<16xf32>
    %210 = vector.multi_reduction <add>, %209, %cst_86 [1] : vector<16x32xf32> to vector<16xf32>
    %211 = vector.shape_cast %210 : vector<16xf32> to vector<16x1xf32>
    %cst_87 = arith.constant 3.200000e+01 : f32
    %212 = vector.broadcast %cst_87 : f32 to vector<16x1xf32>
    %213 = arith.divf %211, %212 : vector<16x1xf32>
    %214 = vector.broadcast %206 : vector<16x1xf32> to vector<16x32xf32>
    %215 = arith.subf %202, %214 : vector<16x32xf32>
    %cst_88 = arith.constant 9.99999974E-6 : f32
    %216 = vector.broadcast %cst_88 : f32 to vector<16x1xf32>
    %217 = arith.addf %213, %216 : vector<16x1xf32>
    %218 = math.rsqrt %217 : vector<16x1xf32>
    %219 = vector.broadcast %218 : vector<16x1xf32> to vector<16x32xf32>
    %220 = arith.mulf %215, %219 : vector<16x32xf32>
    %221 = arith.addf %144, %220 : vector<16x32xf32>
    %c536 = arith.constant 536 : index
    %c0_89 = arith.constant 0 : index
    %222 = vector.load %arg4[%c536, %c0_89] : memref<568x32xf32, #tpu.memory_space<vmem>>, vector<32x32xf32>
    %cst_90 = arith.constant dense<0.000000e+00> : vector<16x32xf32>
    %223 = tpu.matmul %221, %222, %cst_90 {dimension_numbers = #tpu.dot_dimension_numbers<[1], [0], [0], [1], [0, 0, 1, 1], [], []>} : vector<16x32xf32>, vector<32x32xf32>, vector<16x32xf32> -> vector<16x32xf32>
    %224 = vector.extract_strided_slice %7 {offsets = [12, 0], sizes = [1, 32], strides = [1, 1]} : vector<16x32xf32> to vector<1x32xf32>
    %225 = vector.broadcast %224 : vector<1x32xf32> to vector<16x32xf32>
    %226 = arith.addf %223, %225 : vector<16x32xf32>
    %cst_91 = arith.constant 0.000000e+00 : f32
    %227 = vector.broadcast %cst_91 : f32 to vector<16x32xf32>
    %228 = arith.maximumf %226, %227 : vector<16x32xf32>
    %cst_92 = arith.constant dense<0.000000e+00> : vector<16x128xf32>
    %229 = tpu.matmul %228, %5, %cst_92 {dimension_numbers = #tpu.dot_dimension_numbers<[1], [0], [0], [1], [0, 0, 1, 1], [], []>} : vector<16x32xf32>, vector<32x128xf32>, vector<16x128xf32> -> vector<16x128xf32>
    %230 = vector.broadcast %6 : vector<1x128xf32> to vector<16x128xf32>
    %231 = arith.addf %229, %230 : vector<16x128xf32>
    %232 = arith.addf %2, %231 : vector<16x128xf32>
    %c0_93 = arith.constant 0 : index
    %c0_94 = arith.constant 0 : index
    %233 = vector.load %arg8[%c0_93, %c0_94] : memref<16x128xf32, #tpu.memory_space<vmem>>, vector<16x128xf32>
    tpu.vector_store %arg8[%c0_93, %c0_94], %232 {strides = array<i32>} : memref<16x128xf32, #tpu.memory_space<vmem>>, vector<16x128xf32>,
    return
  }
}

</mosaic_0001>

<bundles_post_ra>
// kernel: tpu_custom_call.1
= control target key start
LH: loop header
LB: loop body
LE: loop exit
PB: predicated region body
PF: predicated region fallthrough
CT: control target
= control target key end

     0   :  { %vm78_vm0 = vcmask 130048   ;;  %vm286_vm1 = vcmask 64512   ;;  %s5616_s0 = inlined_call_operand.vmem [shape: f32[16,16], index: 0, kind: input, shape index: {}]   ;;  %s5617_s1 = inlined_call_operand.vmem [shape: f32[80,8], index: 1, kind: input, shape index: {}]   ;;  %s5618_s2 = inlined_call_operand.vmem [shape: f32[16,128], index: 2, kind: input, shape index: {}]   ;;  %s5619_s3 = inlined_call_operand.vmem [shape: bf16[160,16], index: 3, kind: input, shape index: {}]   ;;  %s5620_s4 = inlined_call_operand.vmem [shape: f32[568,32], index: 4, kind: input, shape index: {}]   ;;  %s5621_s5 = inlined_call_operand.vmem [shape: f32[16,32], index: 5, kind: input, shape index: {}]   ;;  %s5622_s6 = inlined_call_operand.vmem [shape: f32[32,128], index: 6, kind: input, shape index: {}]   ;;  %s5623_s7 = inlined_call_operand.vmem [shape: f32[1,128], index: 7, kind: input, shape index: {}]   ;;  %s5624_s8 = inlined_call_operand.hbm [shape: f32[16,128], index: 8, kind: output, shape index: {}]  }
   0x1   :  { %v72_v0 = vld [vmem:[%s5620_s4] sm:$0xff]  ;;  %v73_v1 = vld [vmem:[%s5620_s4 + $0x8] sm:$0xff]  ;;  %v281_v4 = vld [vmem:[%s5620_s4 + $0x30] sm:$0xff] }
   0x2   :  { %v31_v2 = vld [vmem:[%s5616_s0] sm:$0xff]  ;;  %v4304_v3 = vpack.c.bf16 %v73_v1, %v72_v0  ;;  %v32_v5 = vld [vmem:[%s5616_s0 + $0x8] sm:$0xff]  ;;  %v74_v7 = vld [vmem:[%s5620_s4 + $0x10] sm:$0xff] }
   0x3   :  { %3906 = vmatprep.mubr.msk.f32.mxu0 %vm78_vm0, %v31_v2  ;;  %v33_v6 = vld [vmem:[%s5617_s1] sm:$0xff]  ;;  %v75_v8 = vld [vmem:[%s5620_s4 + $0x18] sm:$0xff]  ;;  %v34_v9 = vld [vmem:[%s5617_s1 + $0x8] sm:$0xff] }
   0x4   :  { %4305 = vmatprep.subr.bf16.mxu0 %v4304_v3  ;;  %v4308_v10 = vpack.c.bf16 %v75_v8, %v74_v7  ;;  %v35_v11 = vld [vmem:[%s5617_s1 + $0x10] sm:$0xff]  ;;  %v36_v12 = vld [vmem:[%s5617_s1 + $0x18] sm:$0xff]  ;;  %v37_v13 = vld [vmem:[%s5617_s1 + $0x20] sm:$0xff] }
   0x5   :  { %4307 = vmatpush3.bf16.msra.mxu0 %v4304_v3 }
   0x6   :  { %3920 = vmatprep.subr.mxu0 %v281_v4  ;;  %4309 = vmatprep.subr.bf16.mxu1 %v4308_v10 }
   0x7   :  { %4311 = vmatpush3.bf16.msra.mxu1 %v4308_v10 }
   0x8   :  { %3907 = vmatmul.mubr.msk.f32.vlgmr.msra.gmra.mrb[0].mxu0 %vm78_vm0, %v32_v5 }
   0x9   :  { %3921 = vmatpush3.msra.mxu0 %v281_v4  ;;  %3922 = vmatprep.mubr.msk.f32.mxu0 %vm286_vm1, %v33_v6 }
   0xc   :  { %3923 = vmatmul.mubr.msk.f32.vlgmr.msra.gmra.mrb[2].mxu0 %vm286_vm1, %v34_v9 }
   0xd   :  { %3925 = vmatprep.mubr.msk.f32.mxu0 %vm286_vm1, %v35_v11 }
   0xe   :  { %13 = vsyncpa [#allocation3], 0  ;;  %v38_v14 = vld [vmem:[%s5617_s1 + $0x28] sm:$0xff]  ;;  %v39_v15 = vld [vmem:[%s5617_s1 + $0x30] sm:$0xff]  ;;  %v160_v25 = vlaneseq  ;;  %vm172_vm2 = vcmask 261120   ;;  %vm4639_vm3 = vmmov 0  }
   0xf   :  { %v40_v16 = vld [vmem:[%s5617_s1 + $0x38] sm:$0xff]  ;;  %v41_v17 = vld [vmem:[%s5617_s1 + $0x40] sm:$0xff]  ;;  %v42_v18 = vld [vmem:[%s5617_s1 + $0x48] sm:$0xff]  ;;  %vm1739_vm4 = vcmask 654336   ;;  %s4640_s0 = smov [#allocation2]  }
  0x10   :  { %3926 = vmatmul.mubr.msk.f32.gmra.mrb[4].mxu0 %vm286_vm1, %v36_v12  ;;  %v76_v19 = vld [vmem:[%s5620_s4 + $0x20] sm:$0xff]  ;;  %v77_v20 = vld [vmem:[%s5620_s4 + $0x28] sm:$0xff]  ;;  %v282_v22 = vld [vmem:[%s5620_s4 + $0x38] sm:$0xff]  ;;  %v4763_v26 = vshrl.u32 %v160_v25, 7  ;;  %s3509_s1 = sshll.u32 %s4640_s0, 4  ;;  %s3510_s1 = int_to_ptr.vmem [resolvable:$true] %s3509_s1 }
  0x11   :  { %3928 = vmatprep.mubr.msk.f32.mxu0 %vm286_vm1, %v37_v13  ;;  %v4312_v21 = vpack.c.bf16 %v77_v20, %v76_v19  ;;  %v283_v23 = vld [vmem:[%s5620_s4 + $0x40] sm:$0xff]  ;;  %v284_v36 = vld [vmem:[%s5620_s4 + $0x48] sm:$0xff]  ;;  %v285_v37 = vld [vmem:[%s5620_s4 + $0x50] sm:$0xff]  ;;  %p4619_p1 = scmp.lt.s32.totalorder %s3510_s1, %s3510_s1 }
  0x12   :  { %v4316_v24 = vpack.c.bf16 %v283_v23, %v282_v22  ;;  %v162_v27 = vsub.s32 0, %v4763_v26  ;;  %v4769_v28 = vld [vmem:[%s5621_s5] sm:$0xff]  ;;  %v434_v30 = vsub.s32 2, %v4763_v26  ;;  %v4320_v42 = vpack.c.bf16 %v285_v37, %v284_v36 }
  0x13   :  { %4313 = vmatprep.subr.bf16.mxu1 %v4312_v21  ;;  %v170_v7 = vsub.s32 1, %v4763_v26  ;;  %v458_v11 = vsub.s32 3, %v4763_v26 }
  0x14   :  { %3929 = vmatmul.mubr.msk.f32.gmra.mrb[6].mxu0 %vm286_vm1, %v38_v14  ;;  %4315 = vmatpush3.bf16.msra.mxu1 %v4312_v21  ;;  %v163_v29 = vrot.slane %v4769_v28, %v162_v27  ;;  %v435_v34 = vrot.slane %v4769_v28, %v434_v30 }
  0x15   :  { %3931 = vmatprep.mubr.msk.f32.mxu0 %vm286_vm1, %v39_v15  ;;  %4317 = vmatprep.subr.bf16.mxu1 %v4316_v24  ;;  %v171_v8 = vrot.slane %v4769_v28, %v170_v7  ;;  %v459_v15 = vrot.slane %v4769_v28, %v458_v11 }
  0x18   :  { %3932 = vmatmul.mubr.msk.f32.gmra.mrb[8].mxu0 %vm286_vm1, %v40_v16 }
  0x19   :  { %3934 = vmatprep.mubr.msk.f32.mxu0 %vm286_vm1, %v41_v17 }
  0x1c   :  { %3935 = vmatmul.mubr.msk.f32.gmra.mrb[10].mxu0 %vm286_vm1, %v42_v18 }
  0xdb   :  { %v3908_v31 = vpop.f32.mrb[0].mxu0 }
  0xdc   :  { %v165_v32 = vadd.f32 %v3908_v31, %v163_v29  ;;  %v151_v33 = vpop.f32.mrb[1].mxu0 }
  0xdd   :  { %v164_v35 = vadd.f32 %v163_v29, %v151_v33 }
  0xde   :  { %v167_v40 = vmax.f32 %v165_v32, 0.0 }
  0xdf   :  { %v166_v38 = vmax.f32 %v164_v35, 0.0  ;;  %v3924_v39 = vpop.f32.mrb[2].mxu0 }
  0xe0   :  { %v383_v41 = vpop.f32.mrb[3].mxu0  ;;  %v437_v44 = vadd.f32 %v3924_v39, %v435_v34 }
  0xe1   :  { %3917 = vmatprep.mubr.msk.f32.mxu1 %vm172_vm2, %v166_v38  ;;  %v436_v43 = vadd.f32 %v435_v34, %v383_v41 }
  0xe2   :  { %3918 = vmatmul.mubr.msk.f32.vlgmr.msra.gmra.mrb[0].mxu1 %vm172_vm2, %v167_v40  ;;  %v447_v49 = vmax.f32 %v437_v44, 0.0 }
  0xe3   :  { %4319 = vmatpush3.bf16.msra.mxu1 %v4316_v24  ;;  %v446_v45 = vmax.f32 %v436_v43, 0.0  ;;  %v3927_v46 = vpop.f32.mrb[4].mxu0 }
  0xe4   :  { %4321 = vmatprep.subr.bf16.mxu1 %v4320_v42  ;;  %v393_v47 = vpop.f32.mrb[5].mxu0  ;;  %v439_v50 = vadd.f32 %v3927_v46, %v435_v34 }
  0xe5   :  { %v438_v48 = vadd.f32 %v435_v34, %v393_v47  ;;  %3945 = vmatprep.mubr.msk.f32.mxu1 %vm172_vm2, %v446_v45 }
  0xe6   :  { %v449_v55 = vmax.f32 %v439_v50, 0.0 }
  0xe7   :  { %4323 = vmatpush3.bf16.msra.mxu1 %v4320_v42  ;;  %v448_v51 = vmax.f32 %v438_v48, 0.0  ;;  %v3930_v52 = vpop.f32.mrb[6].mxu0 }
  0xe8   :  { %v403_v53 = vpop.f32.mrb[7].mxu0  ;;  %v441_v56 = vadd.f32 %v3930_v52, %v435_v34 }
  0xe9   :  { %v440_v54 = vadd.f32 %v435_v34, %v403_v53 }
  0xea   :  { %3946 = vmatmul.mubr.msk.f32.vlgmr.msra.gmra.mrb[2].mxu1 %vm172_vm2, %v447_v49  ;;  %v451_v61 = vmax.f32 %v441_v56, 0.0 }
  0xeb   :  { %v450_v57 = vmax.f32 %v440_v54, 0.0  ;;  %3948 = vmatprep.mubr.msk.f32.mxu1 %vm172_vm2, %v448_v51  ;;  %v3933_v58 = vpop.f32.mrb[8].mxu0 }
  0xec   :  { %v413_v59 = vpop.f32.mrb[9].mxu0  ;;  %v443_v62 = vadd.f32 %v3933_v58, %v435_v34 }
  0xed   :  { %v442_v60 = vadd.f32 %v435_v34, %v413_v59 }
  0xee   :  { %3949 = vmatmul.mubr.msk.f32.gmra.mrb[4].mxu1 %vm172_vm2, %v449_v55  ;;  %v453_v3 = vmax.f32 %v443_v62, 0.0 }
  0xef   :  { %v452_v63 = vmax.f32 %v442_v60, 0.0  ;;  %3951 = vmatprep.mubr.msk.f32.mxu1 %vm172_vm2, %v450_v57  ;;  %v3936_v0 = vpop.f32.mrb[10].mxu0 }
  0xf0   :  { %v423_v1 = vpop.f32.mrb[11].mxu0  ;;  %v445_v4 = vadd.f32 %v3936_v0, %v435_v34 }
  0xf1   :  { %v444_v2 = vadd.f32 %v435_v34, %v423_v1 }
  0xf2   :  { %3952 = vmatmul.mubr.msk.f32.gmra.mrb[6].mxu1 %vm172_vm2, %v451_v61  ;;  %v455_v6 = vmax.f32 %v445_v4, 0.0 }
  0xf3   :  { %v454_v5 = vmax.f32 %v444_v2, 0.0  ;;  %3954 = vmatprep.mubr.msk.f32.mxu1 %vm172_vm2, %v452_v63 }
  0xf6   :  { %3955 = vmatmul.mubr.msk.f32.gmra.mrb[8].mxu1 %vm172_vm2, %v453_v3 }
  0xf7   :  { %3957 = vmatprep.mubr.msk.f32.mxu1 %vm172_vm2, %v454_v5 }
  0xfa   :  { %3958 = vmatmul.mubr.msk.f32.gmra.mrb[10].mxu1 %vm172_vm2, %v455_v6 }
 0x1b5   :  { %v3919_v9 = vpop.f32.mrb[0].mxu1 }
 0x1b6   :  { %v245_v10 = vpop.f32.mrb[1].mxu1  ;;  %v251_v13 = vadd.f32 %v3919_v9, %v171_v8 }
 0x1b7   :  { %v246_v12 = vadd.f32 %v245_v10, %v171_v8 }
 0x1b8   :  { %v257_v17 = vsel %vm172_vm2, %v251_v13, 0.0 }
 0x1b9   :  { %v254_v14 = vsel %vm172_vm2, %v246_v12, 0.0 }
 0x1ba   :  { %255 = vadd.xlane.f32.xlu0 %v254_v14 }
 0x1bd   :  { %v3947_v16 = vpop.f32.mrb[2].mxu1 }
 0x1be   :  { %v4806_v18 = vadd.f32 %v3947_v16, %v459_v15  ;;  %v556_v19 = vpop.f32.mrb[3].mxu1  ;;  %258 = vadd.xlane.f32.xlu0 %v257_v17 }
 0x1bf   :  { %v557_v20 = vadd.f32 %v556_v19, %v459_v15 }
 0x1c0   :  { %v608_v61 = vsel %vm172_vm2, %v4806_v18, 0.0 }
 0x1c1   :  { %v3950_v21 = vpop.f32.mrb[4].mxu1  ;;  %v605_v22 = vsel %vm172_vm2, %v557_v20, 0.0 }
 0x1c2   :  { %v4809_v23 = vadd.f32 %v3950_v21, %v459_v15  ;;  %v566_v24 = vpop.f32.mrb[5].mxu1  ;;  %606 = vadd.xlane.f32.xlu0 %v605_v22 }
 0x1c3   :  { %v567_v25 = vadd.f32 %v566_v24, %v459_v15 }
 0x1c4   :  { %v614_v3 = vsel %vm172_vm2, %v4809_v23, 0.0 }
 0x1c5   :  { %v3953_v29 = vpop.f32.mrb[6].mxu1  ;;  %v611_v31 = vsel %vm172_vm2, %v567_v25, 0.0 }
 0x1c6   :  { %v4812_v32 = vadd.f32 %v3953_v29, %v459_v15  ;;  %v576_v33 = vpop.f32.mrb[7].mxu1  ;;  %612 = vadd.xlane.f32.xlu0 %v611_v31  ;;  %v4526_v29 = vld [vmem:[%s5619_s3] sm:$0xff]  }
 0x1c7   :  { %v577_v34 = vadd.f32 %v576_v33, %v459_v15  ;;  %3962 = vmatprep.mubr.msk.bf16.mxu0 %vm78_vm0, %v4526_v29  ;;  %v4958_v29 = vld [vmem:[%s5619_s3 + $0x38] sm:$0xff]  }
 0x1c8   :  { %v620_v10 = vsel %vm172_vm2, %v4812_v32, 0.0 }
 0x1c9   :  { %v3956_v35 = vpop.f32.mrb[8].mxu1  ;;  %v617_v36 = vsel %vm172_vm2, %v577_v34, 0.0 }
 0x1ca   :  { %v4815_v37 = vadd.f32 %v3956_v35, %v459_v15  ;;  %v586_v38 = vpop.f32.mrb[9].mxu1  ;;  %618 = vadd.xlane.f32.xlu0 %v617_v36 }
 0x1cb   :  { %v587_v39 = vadd.f32 %v586_v38, %v459_v15 }
 0x1cc   :  { %v626_v17 = vsel %vm172_vm2, %v4815_v37, 0.0 }
 0x1cd   :  { %v3959_v40 = vpop.f32.mrb[10].mxu1  ;;  %v623_v41 = vsel %vm172_vm2, %v587_v39, 0.0 }
 0x1ce   :  { %v4818_v42 = vadd.f32 %v3959_v40, %v459_v15  ;;  %v596_v43 = vpop.f32.mrb[11].mxu1  ;;  %624 = vadd.xlane.f32.xlu0 %v623_v41 }
 0x1cf   :  { %v597_v44 = vadd.f32 %v596_v43, %v459_v15 }
 0x1d0   :  { %v632_v22 = vsel %vm172_vm2, %v4818_v42, 0.0 }
 0x1d1   :  { %v629_v45 = vsel %vm172_vm2, %v597_v44, 0.0 }
 0x1d2   :  { %630 = vadd.xlane.f32.xlu0 %v629_v45 }
 0x247   :  { %v256_v46 = vpop.xlane.xlu0 %255 }
 0x248   :  { %v261_v47 = vmul.f32 0.03125, %v256_v46 }
 0x24a   :  { %v4821_v48 = vsub.f32 %v246_v12, %v261_v47 }
 0x24b   :  { %v259_v49 = vpop.xlane.xlu0 %258 }
 0x24c   :  { %v262_v50 = vmul.f32 0.03125, %v259_v49  ;;  %v265_v51 = vmul.f32 %v4821_v48, %v4821_v48 }
 0x24e   :  { %v4825_v52 = vsub.f32 %v251_v13, %v262_v50  ;;  %v267_v53 = vsel %vm172_vm2, %v265_v51, 0.0 }
 0x24f   :  { %268 = vadd.xlane.f32.xlu1 %v267_v53  ;;  %v607_v54 = vpop.xlane.xlu0 %606 }
 0x250   :  { %v635_v55 = vmul.f32 0.03125, %v607_v54  ;;  %v266_v56 = vmul.f32 %v4825_v52, %v4825_v52 }
 0x252   :  { %v4830_v57 = vsub.f32 %v557_v20, %v635_v55  ;;  %v270_v58 = vsel %vm172_vm2, %v266_v56, 0.0 }
 0x253   :  { %271 = vadd.xlane.f32.xlu1 %v270_v58  ;;  %v613_v59 = vpop.xlane.xlu0 %612 }
 0x254   :  { %v637_v60 = vmul.f32 0.03125, %v613_v59  ;;  %v655_v62 = vmul.f32 %v4830_v57, %v4830_v57 }
 0x256   :  { %v4837_v63 = vsub.f32 %v567_v25, %v637_v60  ;;  %v665_v0 = vsel %vm172_vm2, %v655_v62, 0.0 }
 0x257   :  { %609 = vadd.xlane.f32.xlu1 %v608_v61  ;;  %666 = vadd.xlane.f32.xlu0 %v665_v0  ;;  %v619_v1 = vpop.xlane.xlu0 %618 }
 0x258   :  { %v639_v2 = vmul.f32 0.03125, %v619_v1  ;;  %v657_v4 = vmul.f32 %v4837_v63, %v4837_v63 }
 0x25a   :  { %v4844_v5 = vsub.f32 %v577_v34, %v639_v2  ;;  %v671_v6 = vsel %vm172_vm2, %v657_v4, 0.0 }
 0x25b   :  { %615 = vadd.xlane.f32.xlu1 %v614_v3  ;;  %672 = vadd.xlane.f32.xlu0 %v671_v6  ;;  %v625_v8 = vpop.xlane.xlu0 %624 }
 0x25c   :  { %v641_v9 = vmul.f32 0.03125, %v625_v8  ;;  %v659_v12 = vmul.f32 %v4844_v5, %v4844_v5 }
 0x25e   :  { %v4851_v13 = vsub.f32 %v587_v39, %v641_v9  ;;  %v677_v14 = vsel %vm172_vm2, %v659_v12, 0.0 }
 0x25f   :  { %621 = vadd.xlane.f32.xlu1 %v620_v10  ;;  %678 = vadd.xlane.f32.xlu0 %v677_v14  ;;  %v631_v15 = vpop.xlane.xlu0 %630  ;;  %v4529_v14 = vld [vmem:[%s5619_s3 + $0x18] sm:$0xff]  }
 0x260   :  { %v643_v16 = vmul.f32 0.03125, %v631_v15  ;;  %v661_v19 = vmul.f32 %v4851_v13, %v4851_v13  ;;  %v929_v15 = vld [vmem:[%s5620_s4 + $0x58] sm:$0xff] }
 0x262   :  { %v4858_v20 = vsub.f32 %v597_v44, %v643_v16  ;;  %v683_v21 = vsel %vm172_vm2, %v661_v19, 0.0  ;;  %v930_v16 = vld [vmem:[%s5620_s4 + $0x60] sm:$0xff]  ;;  %v4938_v19 = vld [vmem:[%s5619_s3 + $0x28] sm:$0xff]  }
 0x263   :  { %627 = vadd.xlane.f32.xlu1 %v626_v17  ;;  %684 = vadd.xlane.f32.xlu0 %v683_v21  ;;  %v4324_v17 = vpack.c.bf16 %v930_v16, %v929_v15  ;;  %v931_v21 = vld [vmem:[%s5620_s4 + $0x68] sm:$0xff] }
 0x264   :  { %v663_v24 = vmul.f32 %v4858_v20, %v4858_v20 }
 0x265   :  { %4325 = vmatprep.subr.bf16.mxu1 %v4324_v17 }
 0x266   :  { %v689_v25 = vsel %vm172_vm2, %v663_v24, 0.0  ;;  %4327 = vmatpush3.bf16.msra.mxu1 %v4324_v17  ;;  %v4949_v24 = vld [vmem:[%s5619_s3 + $0x30] sm:$0xff]  }
 0x267   :  { %633 = vadd.xlane.f32.xlu1 %v632_v22  ;;  %690 = vadd.xlane.f32.xlu0 %v689_v25  ;;  %v932_v22 = vld [vmem:[%s5620_s4 + $0x70] sm:$0xff] }
 0x268   :  { %v4328_v25 = vpack.c.bf16 %v932_v22, %v931_v21  ;;  %v937_v22 = vld [vmem:[%s5620_s4 + $0x98] sm:$0xff] }
 0x26a   :  { %4329 = vmatprep.subr.bf16.mxu1 %v4328_v25 }
 0x26b   :  { %4331 = vmatpush3.bf16.msra.mxu1 %v4328_v25  ;;  %v938_v25 = vld [vmem:[%s5620_s4 + $0xa0] sm:$0xff] }
 0x2dc   :  { %v269_v31 = vpop.xlane.xlu1 %268 }
 0x2dd   :  { %v273_v33 = vmul.f32 0.03125, %v269_v31  ;;  %v4963_v31 = vld [vmem:[%s5619_s3 + $0x40] sm:$0xff]  }
 0x2df   :  { %v275_v34 = vadd.f32 1e-05, %v273_v33  ;;  %v4972_v33 = vld [vmem:[%s5619_s3 + $0x48] sm:$0xff]  }
 0x2e0   :  { %v272_v35 = vpop.xlane.xlu1 %271 }
 0x2e1   :  { %v274_v36 = vmul.f32 0.03125, %v272_v35  ;;  %4536 = vrsqrt.f32 %v275_v34  ;;  %v933_v34 = vld [vmem:[%s5620_s4 + $0x78] sm:$0xff]  ;;  %v934_v35 = vld [vmem:[%s5620_s4 + $0x80] sm:$0xff] }
 0x2e3   :  { %v276_v38 = vadd.f32 1e-05, %v274_v36  ;;  %v4332_v36 = vpack.c.bf16 %v934_v35, %v933_v34 }
 0x2e4   :  { %v610_v39 = vpop.xlane.xlu1 %609  ;;  %v667_v40 = vpop.xlane.xlu0 %666 }
 0x2e5   :  { %4538 = vrsqrt.f32 %v276_v38  ;;  %v636_v41 = vmul.f32 0.03125, %v610_v39  ;;  %v695_v43 = vmul.f32 0.03125, %v667_v40  ;;  %4333 = vmatprep.subr.bf16.mxu1 %v4332_v36  ;;  %v941_v40 = vld [vmem:[%s5620_s4 + $0xb8] sm:$0xff] }
 0x2e7   :  { %v4871_v44 = vsub.f32 %v4806_v18, %v636_v41  ;;  %v705_v45 = vadd.f32 1e-05, %v695_v43  ;;  %v942_v41 = vld [vmem:[%s5620_s4 + $0xc0] sm:$0xff] }
 0x2e8   :  { %v616_v46 = vpop.xlane.xlu1 %615  ;;  %v673_v38 = vpop.xlane.xlu0 %672  ;;  %v4348_v43 = vpack.c.bf16 %v942_v41, %v941_v40 }
 0x2e9   :  { %4540 = vrsqrt.f32 %v705_v45  ;;  %v638_v47 = vmul.f32 0.03125, %v616_v46  ;;  %v656_v49 = vmul.f32 %v4871_v44, %v4871_v44  ;;  %v697_v45 = vmul.f32 0.03125, %v673_v38 }
 0x2ea   :  { %v4340_v38 = vpack.c.bf16 %v938_v25, %v937_v22 }
 0x2eb   :  { %v4876_v50 = vsub.f32 %v4809_v23, %v638_v47  ;;  %v668_v51 = vsel %vm172_vm2, %v656_v49, 0.0  ;;  %v4537_v54 = vpop.eup %4536  ;;  %v707_v47 = vadd.f32 1e-05, %v697_v45 }
 0x2ec   :  { %669 = vadd.xlane.f32.xlu1 %v668_v51  ;;  %v622_v53 = vpop.xlane.xlu1 %621  ;;  %v4886_v23 = vmul.f32 %v4537_v54, %v4821_v48  ;;  %v679_v39 = vpop.xlane.xlu0 %678 }
 0x2ed   :  { %v640_v55 = vmul.f32 0.03125, %v622_v53  ;;  %v658_v18 = vmul.f32 %v4876_v50, %v4876_v50  ;;  %v699_v49 = vmul.f32 0.03125, %v679_v39  ;;  %4542 = vrsqrt.f32 %v707_v47 }
 0x2ef   :  { %v4539_v56 = vpop.eup %4538  ;;  %v4882_v58 = vsub.f32 %v4812_v32, %v640_v55  ;;  %v674_v59 = vsel %vm172_vm2, %v658_v18, 0.0  ;;  %v709_v55 = vadd.f32 1e-05, %v699_v49 }
 0x2f0   :  { %675 = vadd.xlane.f32.xlu1 %v674_v59  ;;  %v628_v60 = vpop.xlane.xlu1 %627  ;;  %v4889_v61 = vmul.f32 %v4539_v56, %v4825_v52  ;;  %v4527_v52 = vld [vmem:[%s5619_s3 + $0x8] sm:$0xff]   ;;  %v685_v46 = vpop.xlane.xlu0 %684 }
 0x2f1   :  { %v642_v62 = vmul.f32 0.03125, %v628_v60  ;;  %v660_v0 = vmul.f32 %v4882_v58, %v4882_v58  ;;  %v701_v18 = vmul.f32 0.03125, %v685_v46 }
 0x2f2   :  { %v735_v1 = vpack.c.bf16 %v4889_v61, %v4886_v23 }
 0x2f3   :  { %v4541_v2 = vpop.eup %4540  ;;  %v4896_v32 = vsub.f32 %v4815_v37, %v642_v62  ;;  %v680_v3 = vsel %vm172_vm2, %v660_v0, 0.0  ;;  %v4528_v37 = vld [vmem:[%s5619_s3 + $0x10] sm:$0xff]   ;;  %v711_v0 = vadd.f32 1e-05, %v701_v18 }
 0x2f4   :  { %3960 = vmatprep.subr.bf16.mxu0 %v735_v1  ;;  %681 = vadd.xlane.f32.xlu1 %v680_v3  ;;  %v634_v48 = vpop.xlane.xlu1 %633  ;;  %v4900_v4 = vmul.f32 %v4541_v2, %v4830_v57  ;;  %v691_v59 = vpop.xlane.xlu0 %690 }
 0x2f5   :  { %v644_v6 = vmul.f32 0.03125, %v634_v48  ;;  %3961 = vmatpush3.bf16.msra.mxu0 %v735_v1  ;;  %v662_v8 = vmul.f32 %v4896_v32, %v4896_v32  ;;  %v703_v1 = vmul.f32 0.03125, %v691_v59 }
 0x2f6   :  { %3990 = vmatprep.mubr.msk.f32.mxu1 %vm172_vm2, %v4900_v4  ;;  %4349 = vmatprep.subr.bf16.mxu0 %v4348_v43 }
 0x2f7   :  { %v4913_v9 = vsub.f32 %v4818_v42, %v644_v6  ;;  %v686_v57 = vsel %vm172_vm2, %v662_v8, 0.0  ;;  %v4530_v42 = vld [vmem:[%s5619_s3 + $0x20] sm:$0xff]  }
 0x2f8   :  { %3963 = vmatmul.mubr.msk.bf16.vlgmr.msra.gmra.mrb[12].mxu0 %vm78_vm0, %v4527_v52  ;;  %687 = vadd.xlane.f32.xlu1 %v686_v57  ;;  %v713_v52 = vadd.f32 1e-05, %v703_v1  ;;  %v936_v57 = vld [vmem:[%s5620_s4 + $0x90] sm:$0xff] }
 0x2f9   :  { %v664_v10 = vmul.f32 %v4913_v9, %v4913_v9  ;;  %3966 = vmatprep.mubr.msk.bf16.mxu0 %vm78_vm0, %v4528_v37  ;;  %4351 = vmatpush3.bf16.msra.mxu0 %v4348_v43  ;;  %v935_v37 = vld [vmem:[%s5620_s4 + $0x88] sm:$0xff] }
 0x2fa   :  { %v4336_v16 = vpack.c.bf16 %v936_v57, %v935_v37  ;;  %v943_v57 = vld [vmem:[%s5620_s4 + $0xc8] sm:$0xff] }
 0x2fb   :  { %v692_v12 = vsel %vm172_vm2, %v664_v10, 0.0  ;;  %v4543_v10 = vpop.eup %4542 }
 0x2fc   :  { %693 = vadd.xlane.f32.xlu1 %v692_v12  ;;  %v4998_v21 = vmul.f32 %v4543_v10, %v4837_v63  ;;  %v944_v10 = vld [vmem:[%s5620_s4 + $0xd0] sm:$0xff] }
 0x300   :  { %3967 = vmatmul.mubr.msk.bf16.gmra.mrb[16].mxu0 %vm78_vm0, %v4529_v14 }
 0x301   :  { %3970 = vmatprep.mubr.msk.bf16.mxu0 %vm78_vm0, %v4530_v42 }
 0x308   :  { %3971 = vmatmul.mubr.msk.bf16.gmra.mrb[20].mxu0 %vm78_vm0, %v4938_v19 }
 0x309   :  { %3974 = vmatprep.mubr.msk.bf16.mxu0 %vm78_vm0, %v4949_v24 }
 0x310   :  { %3975 = vmatmul.mubr.msk.bf16.gmra.mrb[24].mxu0 %vm78_vm0, %v4958_v29 }
 0x311   :  { %3978 = vmatprep.mubr.msk.bf16.mxu0 %vm78_vm0, %v4963_v31 }
 0x318   :  { %3979 = vmatmul.mubr.msk.bf16.gmra.mrb[28].mxu0 %vm78_vm0, %v4972_v33 }
 0x379   :  { %v670_v51 = vpop.xlane.xlu1 %669 }
 0x37a   :  { %v696_v53 = vmul.f32 0.03125, %v670_v51 }
 0x37c   :  { %v706_v54 = vadd.f32 1e-05, %v696_v53 }
 0x37d   :  { %v676_v56 = vpop.xlane.xlu1 %675 }
 0x37e   :  { %4544 = vrsqrt.f32 %v706_v54  ;;  %v698_v60 = vmul.f32 0.03125, %v676_v56 }
 0x37f   :  { %4546 = vrsqrt.f32 %v709_v55 }
 0x380   :  { %v708_v62 = vadd.f32 1e-05, %v698_v60 }
 0x381   :  { %v682_v2 = vpop.xlane.xlu1 %681 }
 0x382   :  { %4548 = vrsqrt.f32 %v708_v62  ;;  %v700_v3 = vmul.f32 0.03125, %v682_v2 }
 0x383   :  { %4550 = vrsqrt.f32 %v711_v0 }
 0x384   :  { %v710_v48 = vadd.f32 1e-05, %v700_v3 }
 0x385   :  { %v688_v6 = vpop.xlane.xlu1 %687 }
 0x386   :  { %4552 = vrsqrt.f32 %v710_v48  ;;  %v702_v8 = vmul.f32 0.03125, %v688_v6 }
 0x387   :  { %4554 = vrsqrt.f32 %v713_v52 }
 0x388   :  { %v4545_v12 = vpop.eup %4544  ;;  %v712_v14 = vadd.f32 1e-05, %v702_v8 }
 0x389   :  { %v4995_v42 = vmul.f32 %v4545_v12, %v4871_v44  ;;  %v694_v15 = vpop.xlane.xlu1 %693  ;;  %v4547_v34 = vpop.eup %4546  ;;  %v4352_v12 = vpack.c.bf16 %v944_v10, %v943_v57 }
 0x38a   :  { %4556 = vrsqrt.f32 %v712_v14  ;;  %v704_v17 = vmul.f32 0.03125, %v694_v15  ;;  %v5014_v39 = vmul.f32 %v4547_v34, %v4844_v5  ;;  %v1092_v14 = vsub.s32 4, %v4763_v26 }
 0x38b   :  { %3991 = vmatmul.mubr.msk.f32.vlgmr.msra.gmra.mrb[12].mxu1 %vm172_vm2, %v4995_v42  ;;  %4353 = vmatprep.subr.bf16.mxu0 %v4352_v12 }
 0x38c   :  { %v4549_v44 = vpop.eup %4548  ;;  %v714_v35 = vadd.f32 1e-05, %v704_v17  ;;  %3993 = vmatprep.mubr.msk.f32.mxu1 %vm172_vm2, %v4998_v21  ;;  %4335 = vmatpush3.bf16.msra.mxu1 %v4332_v36  ;;  %v1093_v15 = vrot.slane %v4769_v28, %v1092_v14 }
 0x38d   :  { %v5011_v63 = vmul.f32 %v4549_v44, %v4876_v50  ;;  %4337 = vmatprep.subr.bf16.mxu1 %v4336_v16  ;;  %v4551_v40 = vpop.eup %4550  ;;  %4355 = vmatpush3.bf16.msra.mxu0 %v4352_v12 }
 0x38e   :  { %4558 = vrsqrt.f32 %v714_v35  ;;  %v5024_v50 = vmul.f32 %v4551_v40, %v4851_v13 }
 0x38f   :  { %3994 = vmatmul.mubr.msk.f32.gmra.mrb[14].mxu1 %vm172_vm2, %v5011_v63 }
 0x390   :  { %v4553_v41 = vpop.eup %4552  ;;  %3996 = vmatprep.mubr.msk.f32.mxu1 %vm172_vm2, %v5014_v39  ;;  %4339 = vmatpush3.bf16.msra.mxu1 %v4336_v16 }
 0x391   :  { %v5021_v36 = vmul.f32 %v4553_v41, %v4882_v58  ;;  %4341 = vmatprep.subr.bf16.mxu1 %v4340_v38  ;;  %v4555_v43 = vpop.eup %4554 }
 0x392   :  { %v5034_v46 = vmul.f32 %v4555_v43, %v4858_v20  ;;  %v940_v20 = vld [vmem:[%s5620_s4 + $0xb0] sm:$0xff] }
 0x393   :  { %3997 = vmatmul.mubr.msk.f32.gmra.mrb[16].mxu1 %vm172_vm2, %v5021_v36 }
 0x394   :  { %v4557_v5 = vpop.eup %4556  ;;  %3999 = vmatprep.mubr.msk.f32.mxu1 %vm172_vm2, %v5024_v50 }
 0x395   :  { %v5031_v45 = vmul.f32 %v4557_v5, %v4896_v32  ;;  %v939_v32 = vld [vmem:[%s5620_s4 + $0xa8] sm:$0xff] }
 0x396   :  { %v4344_v53 = vpack.c.bf16 %v940_v20, %v939_v32 }
 0x397   :  { %4000 = vmatmul.mubr.msk.f32.gmra.mrb[18].mxu1 %vm172_vm2, %v5031_v45 }
 0x398   :  { %v4559_v58 = vpop.eup %4558  ;;  %4002 = vmatprep.mubr.msk.f32.mxu1 %vm172_vm2, %v5034_v46 }
 0x399   :  { %v5041_v13 = vmul.f32 %v4559_v58, %v4913_v9 }
 0x39b   :  { %4003 = vmatmul.mubr.msk.f32.gmra.mrb[20].mxu1 %vm172_vm2, %v5041_v13 }
 0x3cb   :  { %v3964_v47 = vpop.f32.mrb[12].mxu0 }
 0x3cc   :  { %v850_v49 = vpop.f32.mrb[13].mxu0 }
 0x3cd   :  { %v3965_v51 = vpop.f32.mrb[14].mxu0  ;;  %4013 = vmatprep.mubr.msk.f32.mxu1 %vm172_vm2, %v850_v49 }
 0x3ce   :  { %v853_v54 = vpop.f32.mrb[15].mxu0 }
 0x3cf   :  { %4014 = vmatmul.mubr.msk.f32.vlgmr.msra.gmra.mrb[12].mxu1 %vm172_vm2, %v853_v54 }
 0x3d0   :  { %4016 = vmatprep.mubr.msk.f32.mxu1 %vm172_vm2, %v3964_v47  ;;  %4343 = vmatpush3.bf16.msra.mxu1 %v4340_v38 }
 0x3d1   :  { %4345 = vmatprep.subr.bf16.mxu1 %v4344_v53 }
 0x3d3   :  { %v3968_v9 = vpop.f32.mrb[16].mxu0  ;;  %4017 = vmatmul.mubr.msk.f32.gmra.mrb[14].mxu1 %vm172_vm2, %v3965_v51 }
 0x3d4   :  { %v866_v55 = vpop.f32.mrb[17].mxu0  ;;  %4347 = vmatpush3.bf16.msra.mxu1 %v4344_v53 }
 0x3d5   :  { %v3969_v18 = vpop.f32.mrb[18].mxu0  ;;  %4019 = vmatprep.mubr.msk.f32.mxu1 %vm172_vm2, %v866_v55 }
 0x3d6   :  { %v869_v56 = vpop.f32.mrb[19].mxu0 }
 0x3d7   :  { %4020 = vmatmul.mubr.msk.f32.gmra.mrb[16].mxu1 %vm172_vm2, %v869_v56 }
 0x3d8   :  { %4022 = vmatprep.mubr.msk.f32.mxu1 %vm172_vm2, %v3968_v9 }
 0x3db   :  { %v3972_v59 = vpop.f32.mrb[20].mxu0  ;;  %4023 = vmatmul.mubr.msk.f32.gmra.mrb[18].mxu1 %vm172_vm2, %v3969_v18 }
 0x3dc   :  { %v882_v60 = vpop.f32.mrb[21].mxu0 }
 0x3dd   :  { %v3973_v62 = vpop.f32.mrb[22].mxu0  ;;  %4025 = vmatprep.mubr.msk.f32.mxu1 %vm172_vm2, %v882_v60 }
 0x3de   :  { %v885_v0 = vpop.f32.mrb[23].mxu0 }
 0x3df   :  { %4026 = vmatmul.mubr.msk.f32.gmra.mrb[20].mxu1 %vm172_vm2, %v885_v0 }
 0x3e0   :  { %4036 = vmatprep.mubr.msk.f32.mxu1 %vm172_vm2, %v3972_v59 }
 0x3e3   :  { %v3976_v1 = vpop.f32.mrb[24].mxu0  ;;  %4037 = vmatmul.mubr.msk.f32.vlgmr.msra.gmra.mrb[12].mxu1 %vm172_vm2, %v3973_v62 }
 0x3e4   :  { %v898_v2 = vpop.f32.mrb[25].mxu0 }
 0x3e5   :  { %v3977_v3 = vpop.f32.mrb[26].mxu0  ;;  %4039 = vmatprep.mubr.msk.f32.mxu1 %vm172_vm2, %v898_v2 }
 0x3e6   :  { %v901_v48 = vpop.f32.mrb[27].mxu0 }
 0x3e7   :  { %4040 = vmatmul.mubr.msk.f32.gmra.mrb[14].mxu1 %vm172_vm2, %v901_v48 }
 0x3e8   :  { %4042 = vmatprep.mubr.msk.f32.mxu1 %vm172_vm2, %v3976_v1 }
 0x3eb   :  { %v3980_v52 = vpop.f32.mrb[28].mxu0  ;;  %4043 = vmatmul.mubr.msk.f32.gmra.mrb[16].mxu1 %vm172_vm2, %v3977_v3  ;;  %v1426_v3 = vsub.s32 5, %v4763_v26 }
 0x3ec   :  { %v914_v6 = vpop.f32.mrb[29].mxu0 }
 0x3ed   :  { %v3981_v8 = vpop.f32.mrb[30].mxu0  ;;  %4045 = vmatprep.mubr.msk.f32.mxu1 %vm172_vm2, %v914_v6  ;;  %v1427_v48 = vrot.slane %v4769_v28, %v1426_v3 }
 0x3ee   :  { %v917_v37 = vpop.f32.mrb[31].mxu0 }
 0x3ef   :  { %4046 = vmatmul.mubr.msk.f32.gmra.mrb[18].mxu1 %vm172_vm2, %v917_v37 }
 0x3f0   :  { %4048 = vmatprep.mubr.msk.f32.mxu1 %vm172_vm2, %v3980_v52 }
 0x3f3   :  { %4049 = vmatmul.mubr.msk.f32.gmra.mrb[20].mxu1 %vm172_vm2, %v3981_v8 }
 0x4b6   :  { %v4038_v16 = vpop.f32.mrb[12].mxu1 }
 0x4b7   :  { %v4452_v17 = vadd.f32 %v4038_v16, %v1093_v15  ;;  %v1355_v22 = vpop.f32.mrb[13].mxu1 }
 0x4b8   :  { %v4453_v25 = vadd.f32 %v1355_v22, %v1093_v15 }
 0x4b9   :  { %v1415_v35 = vmax.f32 %v4452_v17, 0.0 }
 0x4ba   :  { %v1414_v34 = vmax.f32 %v4453_v25, 0.0  ;;  %v4041_v44 = vpop.f32.mrb[14].mxu1 }
 0x4bb   :  { %v4454_v38 = vadd.f32 %v4041_v44, %v1093_v15  ;;  %v1365_v40 = vpop.f32.mrb[15].mxu1 }
 0x4bc   :  { %v4455_v41 = vadd.f32 %v1365_v40, %v1093_v15  ;;  %4059 = vmatprep.mubr.msk.f32.mxu0 %vm172_vm2, %v1414_v34 }
 0x4bd   :  { %4060 = vmatmul.mubr.msk.f32.vlgmr.msra.gmra.mrb[32].mxu0 %vm172_vm2, %v1415_v35  ;;  %v1417_v58 = vmax.f32 %v4454_v38, 0.0 }
 0x4be   :  { %v1416_v43 = vmax.f32 %v4455_v41, 0.0  ;;  %v4044_v5 = vpop.f32.mrb[16].mxu1 }
 0x4bf   :  { %v4456_v32 = vadd.f32 %v4044_v5, %v1093_v15  ;;  %v1375_v20 = vpop.f32.mrb[17].mxu1 }
 0x4c0   :  { %v4457_v47 = vadd.f32 %v1375_v20, %v1093_v15  ;;  %4062 = vmatprep.mubr.msk.f32.mxu0 %vm172_vm2, %v1416_v43 }
 0x4c1   :  { %4063 = vmatmul.mubr.msk.f32.gmra.mrb[34].mxu0 %vm172_vm2, %v1417_v58  ;;  %v1419_v53 = vmax.f32 %v4456_v32, 0.0 }
 0x4c2   :  { %v1418_v49 = vmax.f32 %v4457_v47, 0.0  ;;  %v4047_v51 = vpop.f32.mrb[18].mxu1 }
 0x4c3   :  { %v4458_v54 = vadd.f32 %v4047_v51, %v1093_v15  ;;  %v1385_v9 = vpop.f32.mrb[19].mxu1 }
 0x4c4   :  { %v4459_v55 = vadd.f32 %v1385_v9, %v1093_v15  ;;  %4065 = vmatprep.mubr.msk.f32.mxu0 %vm172_vm2, %v1418_v49 }
 0x4c5   :  { %4066 = vmatmul.mubr.msk.f32.gmra.mrb[36].mxu0 %vm172_vm2, %v1419_v53  ;;  %v1421_v59 = vmax.f32 %v4458_v54, 0.0 }
 0x4c6   :  { %v1420_v18 = vmax.f32 %v4459_v55, 0.0  ;;  %v4050_v56 = vpop.f32.mrb[20].mxu1 }
 0x4c7   :  { %v4460_v60 = vadd.f32 %v4050_v56, %v1093_v15  ;;  %v1395_v62 = vpop.f32.mrb[21].mxu1 }
 0x4c8   :  { %v4461_v0 = vadd.f32 %v1395_v62, %v1093_v15  ;;  %4068 = vmatprep.mubr.msk.f32.mxu0 %vm172_vm2, %v1420_v18 }
 0x4c9   :  { %4069 = vmatmul.mubr.msk.f32.gmra.mrb[38].mxu0 %vm172_vm2, %v1421_v59  ;;  %v1423_v2 = vmax.f32 %v4460_v60, 0.0 }
 0x4ca   :  { %v1422_v1 = vmax.f32 %v4461_v0, 0.0 }
 0x4cc   :  { %4071 = vmatprep.mubr.msk.f32.mxu0 %vm172_vm2, %v1422_v1 }
 0x4cd   :  { %4072 = vmatmul.mubr.msk.f32.gmra.mrb[40].mxu0 %vm172_vm2, %v1423_v2 }
 0x590   :  { %v4061_v52 = vpop.f32.mrb[32].mxu0 }
 0x591   :  { %v1530_v6 = vadd.f32 %v4061_v52, %v1427_v48  ;;  %v1524_v8 = vpop.f32.mrb[33].mxu0 }
 0x592   :  { %v1525_v37 = vadd.f32 %v1524_v8, %v1427_v48 }
 0x593   :  { %v1576_v57 = vsel %vm172_vm2, %v1530_v6, 0.0 }
 0x594   :  { %1577 = vadd.xlane.f32.xlu1 %v1576_v57  ;;  %v4064_v10 = vpop.f32.mrb[34].mxu0  ;;  %v1573_v12 = vsel %vm172_vm2, %v1525_v37, 0.0 }
 0x595   :  { %v1540_v15 = vadd.f32 %v4064_v10, %v1427_v48  ;;  %1574 = vadd.xlane.f32.xlu0 %v1573_v12  ;;  %v1534_v16 = vpop.f32.mrb[35].mxu0 }
 0x596   :  { %v1535_v17 = vadd.f32 %v1534_v16, %v1427_v48 }
 0x597   :  { %v1582_v22 = vsel %vm172_vm2, %v1540_v15, 0.0 }
 0x598   :  { %1583 = vadd.xlane.f32.xlu1 %v1582_v22  ;;  %v4067_v25 = vpop.f32.mrb[36].mxu0  ;;  %v1579_v28 = vsel %vm172_vm2, %v1535_v17, 0.0 }
 0x599   :  { %v1550_v34 = vadd.f32 %v4067_v25, %v1427_v48  ;;  %1580 = vadd.xlane.f32.xlu0 %v1579_v28  ;;  %v1544_v44 = vpop.f32.mrb[37].mxu0 }
 0x59a   :  { %v1545_v35 = vadd.f32 %v1544_v44, %v1427_v48 }
 0x59b   :  { %v1588_v38 = vsel %vm172_vm2, %v1550_v34, 0.0 }
 0x59c   :  { %1589 = vadd.xlane.f32.xlu1 %v1588_v38  ;;  %v4070_v40 = vpop.f32.mrb[38].mxu0  ;;  %v1585_v41 = vsel %vm172_vm2, %v1545_v35, 0.0 }
 0x59d   :  { %v1560_v43 = vadd.f32 %v4070_v40, %v1427_v48  ;;  %1586 = vadd.xlane.f32.xlu0 %v1585_v41  ;;  %v1554_v5 = vpop.f32.mrb[39].mxu0 }
 0x59e   :  { %v1555_v58 = vadd.f32 %v1554_v5, %v1427_v48 }
 0x59f   :  { %v1594_v32 = vsel %vm172_vm2, %v1560_v43, 0.0 }
 0x5a0   :  { %1595 = vadd.xlane.f32.xlu1 %v1594_v32  ;;  %v4073_v20 = vpop.f32.mrb[40].mxu0  ;;  %v1591_v47 = vsel %vm172_vm2, %v1555_v58, 0.0 }
 0x5a1   :  { %v1570_v49 = vadd.f32 %v4073_v20, %v1427_v48  ;;  %1592 = vadd.xlane.f32.xlu0 %v1591_v47  ;;  %v1564_v51 = vpop.f32.mrb[41].mxu0 }
 0x5a2   :  { %v1565_v53 = vadd.f32 %v1564_v51, %v1427_v48 }
 0x5a3   :  { %v1600_v54 = vsel %vm172_vm2, %v1570_v49, 0.0 }
 0x5a4   :  { %1601 = vadd.xlane.f32.xlu1 %v1600_v54  ;;  %v1597_v9 = vsel %vm172_vm2, %v1565_v53, 0.0 }
 0x5a5   :  { %1598 = vadd.xlane.f32.xlu0 %v1597_v9 }
 0x621   :  { %v1578_v55 = vpop.xlane.xlu1 %1577 }
 0x622   :  { %v1604_v18 = vmul.f32 0.03125, %v1578_v55  ;;  %v1575_v56 = vpop.xlane.xlu0 %1574 }
 0x623   :  { %v1603_v59 = vmul.f32 0.03125, %v1575_v56 }
 0x624   :  { %v5103_v60 = vsub.f32 %v1530_v6, %v1604_v18 }
 0x625   :  { %v5105_v62 = vsub.f32 %v1525_v37, %v1603_v59  ;;  %v1584_v0 = vpop.xlane.xlu1 %1583 }
 0x626   :  { %v1606_v1 = vmul.f32 0.03125, %v1584_v0  ;;  %v1581_v2 = vpop.xlane.xlu0 %1580  ;;  %v1624_v3 = vmul.f32 %v5103_v60, %v5103_v60 }
 0x627   :  { %v1605_v48 = vmul.f32 0.03125, %v1581_v2  ;;  %v1623_v52 = vmul.f32 %v5105_v62, %v5105_v62 }
 0x628   :  { %v5111_v8 = vsub.f32 %v1540_v15, %v1606_v1  ;;  %v1636_v57 = vsel %vm172_vm2, %v1624_v3, 0.0 }
 0x629   :  { %v5114_v10 = vsub.f32 %v1535_v17, %v1605_v48  ;;  %v1590_v6 = vpop.xlane.xlu1 %1589  ;;  %1637 = vadd.xlane.f32.xlu1 %v1636_v57  ;;  %v1633_v37 = vsel %vm172_vm2, %v1623_v52, 0.0  ;;  %v4638_v57 = vmov 0.0  }
 0x62a   :  { %v1608_v12 = vmul.f32 0.03125, %v1590_v6  ;;  %v1587_v16 = vpop.xlane.xlu0 %1586  ;;  %1634 = vadd.xlane.f32.xlu0 %v1633_v37  ;;  %v1626_v22 = vmul.f32 %v5111_v8, %v5111_v8  ;;  %4074 = vmatprep.subr.bf16.mxu0 %v4638_v57 }
 0x62b   :  { %v1607_v25 = vmul.f32 0.03125, %v1587_v16  ;;  %v1625_v28 = vmul.f32 %v5114_v10, %v5114_v10  ;;  %4084 = vmatprep.mubr.msk.bf16.mxu0 %vm4639_vm3, %v4638_v57 }
 0x62c   :  { %v5121_v15 = vsub.f32 %v1550_v34, %v1608_v12  ;;  %v1642_v44 = vsel %vm172_vm2, %v1626_v22, 0.0 }
 0x62d   :  { %v5124_v17 = vsub.f32 %v1545_v35, %v1607_v25  ;;  %v1596_v38 = vpop.xlane.xlu1 %1595  ;;  %1643 = vadd.xlane.f32.xlu1 %v1642_v44  ;;  %v1639_v40 = vsel %vm172_vm2, %v1625_v28, 0.0 }
 0x62e   :  { %v1610_v41 = vmul.f32 0.03125, %v1596_v38  ;;  %v1593_v5 = vpop.xlane.xlu0 %1592  ;;  %1640 = vadd.xlane.f32.xlu0 %v1639_v40  ;;  %v1628_v32 = vmul.f32 %v5121_v15, %v5121_v15 }
 0x62f   :  { %v1609_v20 = vmul.f32 0.03125, %v1593_v5  ;;  %v1627_v47 = vmul.f32 %v5124_v17, %v5124_v17 }
 0x630   :  { %v5131_v34 = vsub.f32 %v1560_v43, %v1610_v41  ;;  %v1648_v51 = vsel %vm172_vm2, %v1628_v32, 0.0 }
 0x631   :  { %v5134_v35 = vsub.f32 %v1555_v58, %v1609_v20  ;;  %1649 = vadd.xlane.f32.xlu1 %v1648_v51  ;;  %v1602_v54 = vpop.xlane.xlu1 %1601  ;;  %v1645_v9 = vsel %vm172_vm2, %v1627_v47, 0.0 }
 0x632   :  { %v1612_v55 = vmul.f32 0.03125, %v1602_v54  ;;  %1646 = vadd.xlane.f32.xlu0 %v1645_v9  ;;  %v1599_v18 = vpop.xlane.xlu0 %1598  ;;  %v1630_v56 = vmul.f32 %v5131_v34, %v5131_v34 }
 0x633   :  { %v1611_v59 = vmul.f32 0.03125, %v1599_v18  ;;  %v1629_v0 = vmul.f32 %v5134_v35, %v5134_v35 }
 0x634   :  { %v5141_v43 = vsub.f32 %v1570_v49, %v1612_v55  ;;  %v1654_v1 = vsel %vm172_vm2, %v1630_v56, 0.0 }
 0x635   :  { %v5144_v58 = vsub.f32 %v1565_v53, %v1611_v59  ;;  %1655 = vadd.xlane.f32.xlu1 %v1654_v1  ;;  %v1651_v2 = vsel %vm172_vm2, %v1629_v0, 0.0 }
 0x636   :  { %1652 = vadd.xlane.f32.xlu0 %v1651_v2  ;;  %v1632_v3 = vmul.f32 %v5141_v43, %v5141_v43 }
 0x637   :  { %v1631_v48 = vmul.f32 %v5144_v58, %v5144_v58 }
 0x638   :  { %v1660_v52 = vsel %vm172_vm2, %v1632_v3, 0.0 }
 0x639   :  { %1661 = vadd.xlane.f32.xlu1 %v1660_v52  ;;  %v1657_v49 = vsel %vm172_vm2, %v1631_v48, 0.0 }
 0x63a   :  { %1658 = vadd.xlane.f32.xlu0 %v1657_v49 }
 0x667   :  { %1723 = vxpose.xlu0.c.b16.start [1/5] (short) (narrow) %v4938_v19, 16 }
 0x66b   :  { %1724 = vxpose.xlu0.c.b16.cont [2/5] (short) (narrow) %v4949_v24, 16 }
 0x66f   :  { %1725 = vxpose.xlu0.c.b16.cont [3/5] (short) (narrow) %v4958_v29, 16 }
 0x673   :  { %1726 = vxpose.xlu0.c.b16.cont [4/5] (short) (narrow) %v4963_v31, 16 }
 0x677   :  { %1727 = vxpose.xlu0.c.b16.end [5/5] (short) (narrow) %v4972_v33, 16 }
 0x6b6   :  { %v1638_v53 = vpop.xlane.xlu1 %1637 }
 0x6b7   :  { %v1664_v6 = vmul.f32 0.03125, %v1638_v53  ;;  %v1635_v37 = vpop.xlane.xlu0 %1634 }
 0x6b8   :  { %v1663_v12 = vmul.f32 0.03125, %v1635_v37 }
 0x6b9   :  { %v1674_v16 = vadd.f32 1e-05, %v1664_v6 }
 0x6ba   :  { %v1673_v22 = vadd.f32 1e-05, %v1663_v12  ;;  %v1644_v25 = vpop.xlane.xlu1 %1643 }
 0x6bb   :  { %4560 = vrsqrt.f32 %v1674_v16  ;;  %v1666_v28 = vmul.f32 0.03125, %v1644_v25  ;;  %v1641_v44 = vpop.xlane.xlu0 %1640 }
 0x6bc   :  { %4562 = vrsqrt.f32 %v1673_v22  ;;  %v1665_v38 = vmul.f32 0.03125, %v1641_v44 }
 0x6bd   :  { %v1676_v40 = vadd.f32 1e-05, %v1666_v28 }
 0x6be   :  { %v1675_v41 = vadd.f32 1e-05, %v1665_v38  ;;  %v1650_v5 = vpop.xlane.xlu1 %1649 }
 0x6bf   :  { %4564 = vrsqrt.f32 %v1676_v40  ;;  %v1668_v32 = vmul.f32 0.03125, %v1650_v5  ;;  %v1647_v20 = vpop.xlane.xlu0 %1646 }
 0x6c0   :  { %4566 = vrsqrt.f32 %v1675_v41  ;;  %v1667_v47 = vmul.f32 0.03125, %v1647_v20 }
 0x6c1   :  { %v1678_v51 = vadd.f32 1e-05, %v1668_v32 }
 0x6c2   :  { %v1677_v54 = vadd.f32 1e-05, %v1667_v47  ;;  %v1656_v9 = vpop.xlane.xlu1 %1655 }
 0x6c3   :  { %4568 = vrsqrt.f32 %v1678_v51  ;;  %v1670_v55 = vmul.f32 0.03125, %v1656_v9  ;;  %v1653_v18 = vpop.xlane.xlu0 %1652  ;;  %v1785_v9 = vld [vmem:[%s5620_s4 + $0xe0] sm:$0xff] }
 0x6c4   :  { %4570 = vrsqrt.f32 %v1677_v54  ;;  %v1669_v56 = vmul.f32 0.03125, %v1653_v18  ;;  %v1786_v18 = vld [vmem:[%s5620_s4 + $0xe8] sm:$0xff] }
 0x6c5   :  { %v4561_v59 = vpop.eup %4560  ;;  %v1680_v0 = vadd.f32 1e-05, %v1670_v55 }
 0x6c6   :  { %v4563_v1 = vpop.eup %4562  ;;  %v1694_v2 = vmul.f32 %v4561_v59, %v5103_v60  ;;  %v1679_v3 = vadd.f32 1e-05, %v1669_v56  ;;  %v1662_v48 = vpop.xlane.xlu1 %1661  ;;  %v1787_v56 = vld [vmem:[%s5620_s4 + $0xf0] sm:$0xff]  ;;  %v1788_v59 = vld [vmem:[%s5620_s4 + $0xf8] sm:$0xff] }
 0x6c7   :  { %v1693_v52 = vmul.f32 %v4563_v1, %v5105_v62  ;;  %4572 = vrsqrt.f32 %v1680_v0  ;;  %v1672_v49 = vmul.f32 0.03125, %v1662_v48  ;;  %v1659_v53 = vpop.xlane.xlu0 %1658  ;;  %v1789_v0 = vld [vmem:[%s5620_s4 + $0x100] sm:$0xff] }
 0x6c8   :  { %4574 = vrsqrt.f32 %v1679_v3  ;;  %v1671_v6 = vmul.f32 0.03125, %v1659_v53  ;;  %v5164_v37 = vadd.f32 %v1694_v2, %v4995_v42  ;;  %v4364_v1 = vpack.c.bf16 %v1789_v0, %v1788_v59  ;;  %v1790_v2 = vld [vmem:[%s5620_s4 + $0x108] sm:$0xff]  ;;  %v1791_v3 = vld [vmem:[%s5620_s4 + $0x110] sm:$0xff] }
 0x6c9   :  { %v4565_v12 = vpop.eup %4564  ;;  %v1682_v16 = vadd.f32 1e-05, %v1672_v49  ;;  %v5167_v22 = vadd.f32 %v1693_v52, %v4900_v4  ;;  %v4368_v48 = vpack.c.bf16 %v1791_v3, %v1790_v2  ;;  %v2195_v52 = vld [vmem:[%s5620_s4 + $0x138] sm:$0xff]  ;;  %v2196_v49 = vld [vmem:[%s5620_s4 + $0x140] sm:$0xff] }
 0x6ca   :  { %v4567_v25 = vpop.eup %4566  ;;  %v1696_v60 = vmul.f32 %v4565_v12, %v5111_v8  ;;  %v1681_v28 = vadd.f32 1e-05, %v1671_v6  ;;  %v4380_v53 = vpack.c.bf16 %v2196_v49, %v2195_v52  ;;  %v1792_v6 = vld [vmem:[%s5620_s4 + $0x118] sm:$0xff]  ;;  %v1793_v12 = vld [vmem:[%s5620_s4 + $0x120] sm:$0xff] }
 0x6cb   :  { %v1695_v44 = vmul.f32 %v4567_v25, %v5114_v10  ;;  %4576 = vrsqrt.f32 %v1682_v16  ;;  %v1713_v62 = vpack.c.bf16 %v5164_v37, %v5167_v22  ;;  %v4372_v16 = vpack.c.bf16 %v1793_v12, %v1792_v6  ;;  %v2197_v25 = vld [vmem:[%s5620_s4 + $0x148] sm:$0xff] }
 0x6cc   :  { %4578 = vrsqrt.f32 %v1681_v28  ;;  %v5174_v38 = vadd.f32 %v1696_v60, %v5011_v63  ;;  %v2198_v60 = vld [vmem:[%s5620_s4 + $0x150] sm:$0xff] }
 0x6cd   :  { %v4569_v42 = vpop.eup %4568  ;;  %4075 = vmatpush3.bf16.msra.mxu0 %v1713_v62  ;;  %v5177_v40 = vadd.f32 %v1695_v44, %v4998_v21  ;;  %4373 = vmatprep.subr.bf16.mxu1 %v4372_v16  ;;  %v4384_v62 = vpack.c.bf16 %v2198_v60, %v2197_v25  ;;  %v2200_v25 = vld [vmem:[%s5620_s4 + $0x160] sm:$0xff] }
 0x6ce   :  { %v4571_v4 = vpop.eup %4570  ;;  %v1698_v41 = vmul.f32 %v4569_v42, %v5121_v15  ;;  %4076 = vmatprep.subr.bf16.mxu0 %v4638_v57  ;;  %4375 = vmatpush3.bf16.msra.mxu1 %v4372_v16  ;;  %v2199_v16 = vld [vmem:[%s5620_s4 + $0x158] sm:$0xff] }
 0x6cf   :  { %v1697_v8 = vmul.f32 %v4571_v4, %v5124_v17  ;;  %v1714_v10 = vpack.c.bf16 %v5174_v38, %v5177_v40  ;;  %v4388_v60 = vpack.c.bf16 %v2200_v25, %v2199_v16 }
 0x6d0   :  { %v5185_v5 = vadd.f32 %v1698_v41, %v5021_v36  ;;  %v1794_v41 = vld [vmem:[%s5620_s4 + $0x128] sm:$0xff] }
 0x6d1   :  { %v4573_v63 = vpop.eup %4572  ;;  %4077 = vmatpush3.bf16.msra.mxu0 %v1714_v10  ;;  %v5188_v32 = vadd.f32 %v1697_v8, %v5014_v39  ;;  %v1795_v8 = vld [vmem:[%s5620_s4 + $0x130] sm:$0xff] }
 0x6d2   :  { %v4575_v21 = vpop.eup %4574  ;;  %v1700_v20 = vmul.f32 %v4573_v63, %v5131_v34  ;;  %4078 = vmatprep.subr.bf16.mxu0 %v4638_v57  ;;  %v4376_v10 = vpack.c.bf16 %v1795_v8, %v1794_v41  ;;  %v1879_v63 = vsub.s32 6, %v4763_v26 }
 0x6d3   :  { %v1699_v15 = vmul.f32 %v4575_v21, %v5134_v35  ;;  %v1715_v17 = vpack.c.bf16 %v5185_v5, %v5188_v32  ;;  %v4608_v21 = vld [vmem:[%s5621_s5] sm:$0xff] }
 0x6d4   :  { %v5196_v47 = vadd.f32 %v1700_v20, %v5031_v45  ;;  %v1784_v45 = vld [vmem:[%s5620_s4 + $0xd8] sm:$0xff]  ;;  %4377 = vmatprep.subr.bf16.mxu1 %v4376_v10  ;;  %v1880_v20 = vrot.slane %v4608_v21, %v1879_v63 }
 0x6d5   :  { %v4577_v36 = vpop.eup %4576  ;;  %4079 = vmatpush3.bf16.msra.mxu0 %v1715_v17  ;;  %v5199_v51 = vadd.f32 %v1699_v15, %v5024_v50  ;;  %4379 = vmatpush3.bf16.msra.mxu1 %v4376_v10 }
 0x6d6   :  { %v4579_v39 = vpop.eup %4578  ;;  %v1702_v54 = vmul.f32 %v4577_v36, %v5141_v43  ;;  %4080 = vmatprep.subr.bf16.mxu0 %v4638_v57 }
 0x6d7   :  { %v1701_v34 = vmul.f32 %v4579_v39, %v5144_v58  ;;  %v1716_v35 = vpack.c.bf16 %v5196_v47, %v5199_v51  ;;  %v4356_v58 = vpack.c.bf16 %v1785_v9, %v1784_v45  ;;  %v1970_v45 = vsub.s32 7, %v4763_v26  ;;  %v44_v26 = vld [vmem:[%s5618_s2 + $0x8] sm:$0xff] }
 0x6d8   :  { %v5213_v50 = vadd.f32 %v1702_v54, %v5041_v13  ;;  %v5227_v13 = vpop.trf.xlu0 }
 0x6d9   :  { %4081 = vmatpush3.bf16.msra.mxu0 %v1716_v35  ;;  %v5216_v43 = vadd.f32 %v1701_v34, %v5034_v46  ;;  %v4360_v46 = vpack.c.bf16 %v1787_v56, %v1786_v18  ;;  %v4609_v35 = vld [vmem:[%s5619_s3] sm:$0xff]   ;;  %v1971_v9 = vrot.slane %v4608_v21, %v1970_v45 }
 0x6da   :  { %4082 = vmatprep.subr.bf16.mxu0 %v4638_v57 }
 0x6db   :  { %v1717_v55 = vpack.c.bf16 %v5213_v50, %v5216_v43 }
 0x6dd   :  { %4083 = vmatpush3.bf16.msra.mxu0 %v1717_v55 }
 0x6de   :  { %4357 = vmatprep.subr.bf16.mxu0 %v4356_v58 }
 0x6e0   :  { %4085 = vmatmul.mubr.msk.bf16.vlgmr.msra.gmra.mrb[44].mxu0 %vm1739_vm4, %v5227_v13 }
 0x6e1   :  { %4359 = vmatpush3.bf16.msra.mxu0 %v4356_v58  ;;  %4096 = vmatprep.mubr.msk.f32.mxu0 %vm172_vm2, %v4886_v23 }
 0x6e2   :  { %4361 = vmatprep.subr.bf16.mxu0 %v4360_v46 }
 0x6e5   :  { %4363 = vmatpush3.bf16.msra.mxu0 %v4360_v46 }
 0x6e6   :  { %4365 = vmatprep.subr.bf16.mxu0 %v4364_v1 }
 0x6e8   :  { %4097 = vmatmul.mubr.msk.f32.vlgmr.msra.gmra.mrb[42].mxu0 %vm172_vm2, %v4889_v61 }
 0x6e9   :  { %4367 = vmatpush3.bf16.msra.mxu0 %v4364_v1 }
 0x6ea   :  { %4369 = vmatprep.subr.bf16.mxu0 %v4368_v48 }
 0x6ed   :  { %4371 = vmatpush3.bf16.msra.mxu0 %v4368_v48 }
 0x6ee   :  { %4381 = vmatprep.subr.bf16.mxu0 %v4380_v53 }
 0x7b3   :  { %v1777_v28 = vpop.f32.mrb[44].mxu0 }
 0x7b4   :  { %v4086_v44 = vpop.f32.mrb[45].mxu0  ;;  %4107 = vmatprep.mubr.msk.f32.mxu0 %vm172_vm2, %v1777_v28 }
 0x7b5   :  { %v1780_v42 = vpop.f32.mrb[46].mxu0 }
 0x7b6   :  { %4108 = vmatmul.mubr.msk.f32.vlgmr.msra.gmra.mrb[42].mxu0 %vm172_vm2, %v1780_v42  ;;  %v4087_v4 = vpop.f32.mrb[47].mxu0 }
 0x7b7   :  { %4383 = vmatpush3.bf16.msra.mxu0 %v4380_v53  ;;  %4151 = vmatprep.mubr.msk.f32.mxu0 %vm172_vm2, %v5167_v22 }
 0x7b8   :  { %4385 = vmatprep.subr.bf16.mxu0 %v4384_v62 }
 0x7bb   :  { %4387 = vmatpush3.bf16.msra.mxu0 %v4384_v62 }
 0x7bc   :  { %4389 = vmatprep.subr.bf16.mxu0 %v4388_v60 }
 0x7be   :  { %4152 = vmatmul.mubr.msk.f32.vlgmr.msra.gmra.mrb[48].mxu0 %vm172_vm2, %v5164_v37 }
 0x7bf   :  { %4154 = vmatprep.mubr.msk.f32.mxu0 %vm172_vm2, %v5177_v40  ;;  %4391 = vmatpush3.bf16.msra.mxu0 %v4388_v60 }
 0x7c2   :  { %4155 = vmatmul.mubr.msk.f32.gmra.mrb[50].mxu0 %vm172_vm2, %v5174_v38 }
 0x7c3   :  { %4157 = vmatprep.mubr.msk.f32.mxu0 %vm172_vm2, %v5188_v32 }
 0x7c6   :  { %4158 = vmatmul.mubr.msk.f32.gmra.mrb[52].mxu0 %vm172_vm2, %v5185_v5 }
 0x7c7   :  { %4160 = vmatprep.mubr.msk.f32.mxu0 %vm172_vm2, %v5199_v51 }
 0x7ca   :  { %4161 = vmatmul.mubr.msk.f32.gmra.mrb[54].mxu0 %vm172_vm2, %v5196_v47 }
 0x7cb   :  { %4163 = vmatprep.mubr.msk.f32.mxu0 %vm172_vm2, %v5216_v43 }
 0x7ce   :  { %4164 = vmatmul.mubr.msk.f32.gmra.mrb[56].mxu0 %vm172_vm2, %v5213_v50 }
 0x889   :  { %v4109_v15 = vpop.f32.mrb[42].mxu0 }
 0x88a   :  { %v4462_v17 = vadd.f32 %v4109_v15, %v1880_v20  ;;  %v1955_v36 = vpop.f32.mrb[43].mxu0 }
 0x88b   :  { %v4463_v39 = vadd.f32 %v1955_v36, %v1880_v20  ;;  %v4610_v36 = vld [vmem:[%s5619_s3 + $0x8] sm:$0xff]  }
 0x88c   :  { %v1967_v34 = vmax.f32 %v4462_v17, 0.0 }
 0x88d   :  { %v1966_v54 = vmax.f32 %v4463_v39, 0.0  ;;  %v4611_v39 = vld [vmem:[%s5619_s3 + $0x10] sm:$0xff]  }
 0x88f   :  { %4118 = vmatprep.mubr.msk.f32.mxu1 %vm172_vm2, %v1966_v54  ;;  %v2201_v54 = vld [vmem:[%s5620_s4 + $0x168] sm:$0xff] }
 0x890   :  { %4119 = vmatmul.mubr.msk.f32.vlgmr.msra.gmra.mrb[22].mxu1 %vm172_vm2, %v1967_v34 }
 0x891   :  { %4123 = vmatprep.mubr.msk.bf16.mxu1 %vm78_vm0, %v4609_v35  ;;  %v2208_v35 = vld [vmem:[%s5620_s4 + $0x1a0] sm:$0xff] }
 0x963   :  { %v4120_v58 = vpop.f32.mrb[22].mxu1 }
 0x964   :  { %v2044_v55 = vpop.f32.mrb[23].mxu1  ;;  %v2050_v56 = vadd.f32 %v4120_v58, %v1971_v9  ;;  %v2206_v58 = vld [vmem:[%s5620_s4 + $0x190] sm:$0xff] }
 0x965   :  { %v2045_v18 = vadd.f32 %v2044_v55, %v1971_v9  ;;  %v2205_v9 = vld [vmem:[%s5620_s4 + $0x188] sm:$0xff] }
 0x966   :  { %v2056_v59 = vsel %vm172_vm2, %v2050_v56, 0.0 }
 0x967   :  { %v2053_v46 = vsel %vm172_vm2, %v2045_v18, 0.0 }
 0x968   :  { %2054 = vadd.xlane.f32.xlu1 %v2053_v46  ;;  %v4400_v46 = vpack.c.bf16 %v2206_v58, %v2205_v9 }
 0x96c   :  { %2057 = vadd.xlane.f32.xlu1 %v2056_v59 }
 0x9f5   :  { %v2055_v0 = vpop.xlane.xlu1 %2054 }
 0x9f6   :  { %v2059_v1 = vmul.f32 0.03125, %v2055_v0 }
 0x9f8   :  { %v2061_v2 = vsub.f32 %v2045_v18, %v2059_v1 }
 0x9f9   :  { %v2058_v3 = vpop.xlane.xlu1 %2057 }
 0x9fa   :  { %v2060_v48 = vmul.f32 0.03125, %v2058_v3  ;;  %v2063_v52 = vmul.f32 %v2061_v2, %v2061_v2 }
 0x9fc   :  { %v2062_v49 = vsub.f32 %v2050_v56, %v2060_v48  ;;  %v2065_v53 = vsel %vm172_vm2, %v2063_v52, 0.0 }
 0x9fd   :  { %2066 = vadd.xlane.f32.xlu1 %v2065_v53 }
 0x9fe   :  { %v2064_v6 = vmul.f32 %v2062_v49, %v2062_v49 }
 0xa00   :  { %v2068_v12 = vsel %vm172_vm2, %v2064_v6, 0.0 }
 0xa01   :  { %2069 = vadd.xlane.f32.xlu1 %v2068_v12 }
 0xa8a   :  { %v2067_v28 = vpop.xlane.xlu1 %2066 }
 0xa8b   :  { %v2071_v44 = vmul.f32 0.03125, %v2067_v28 }
 0xa8d   :  { %v2073_v62 = vadd.f32 1e-05, %v2071_v44 }
 0xa8e   :  { %v2070_v42 = vpop.xlane.xlu1 %2069 }
 0xa8f   :  { %4580 = vrsqrt.f32 %v2073_v62  ;;  %v2072_v4 = vmul.f32 0.03125, %v2070_v42  ;;  %v2209_v42 = vld [vmem:[%s5620_s4 + $0x1a8] sm:$0xff] }
 0xa91   :  { %v2074_v41 = vadd.f32 1e-05, %v2072_v4  ;;  %v2210_v4 = vld [vmem:[%s5620_s4 + $0x1b0] sm:$0xff] }
 0xa93   :  { %4582 = vrsqrt.f32 %v2074_v41  ;;  %v4408_v41 = vpack.c.bf16 %v2210_v4, %v2209_v42 }
 0xa99   :  { %v4581_v8 = vpop.eup %4580 }
 0xa9a   :  { %v2077_v10 = vmul.f32 %v4581_v8, %v2061_v2  ;;  %v5402_v8 = vld [vmem:[%s5621_s5 + $0x8] sm:$0xff] }
 0xa9c   :  { %v5315_v20 = vadd.f32 %v2077_v10, %v4886_v23  ;;  %v4612_v23 = vld [vmem:[%s5619_s3 + $0x18] sm:$0xff]   ;;  %v2359_v10 = vrot.slane %v5402_v8, %v162_v27 }
 0xa9d   :  { %v4583_v63 = vpop.eup %4582 }
 0xa9e   :  { %v2078_v21 = vmul.f32 %v4583_v63, %v2062_v49 }
 0xaa0   :  { %v5318_v15 = vadd.f32 %v2078_v21, %v4889_v61  ;;  %v4613_v61 = vld [vmem:[%s5619_s3 + $0x20] sm:$0xff]  }
 0xaa2   :  { %v2081_v17 = vpack.c.bf16 %v5318_v15, %v5315_v20 }
 0xaa4   :  { %4121 = vmatprep.subr.bf16.mxu1 %v2081_v17 }
 0xaa5   :  { %4122 = vmatpush3.bf16.msra.mxu1 %v2081_v17 }
 0xaa8   :  { %4124 = vmatmul.mubr.msk.bf16.vlgmr.msra.gmra.mrb[24].mxu1 %vm78_vm0, %v4610_v36 }
 0xaa9   :  { %4127 = vmatprep.mubr.msk.bf16.mxu1 %vm78_vm0, %v4611_v39 }
 0xab0   :  { %4128 = vmatmul.mubr.msk.bf16.gmra.mrb[28].mxu1 %vm78_vm0, %v4612_v23 }
 0xab1   :  { %4131 = vmatprep.mubr.msk.bf16.mxu1 %vm78_vm0, %v4613_v61 }
 0xab8   :  { %4132 = vmatmul.mubr.msk.bf16.gmra.mrb[32].mxu1 %vm78_vm0, %v4938_v19  ;;  %v2202_v19 = vld [vmem:[%s5620_s4 + $0x170] sm:$0xff] }
 0xab9   :  { %4135 = vmatprep.mubr.msk.bf16.mxu1 %vm78_vm0, %v4949_v24  ;;  %v4392_v34 = vpack.c.bf16 %v2202_v19, %v2201_v54  ;;  %v2203_v24 = vld [vmem:[%s5620_s4 + $0x178] sm:$0xff] }
 0xabb   :  { %4393 = vmatprep.subr.bf16.mxu0 %v4392_v34 }
 0xabc   :  { %4395 = vmatpush3.bf16.msra.mxu0 %v4392_v34 }
 0xac0   :  { %4136 = vmatmul.mubr.msk.bf16.gmra.mrb[36].mxu1 %vm78_vm0, %v4958_v29  ;;  %v2204_v29 = vld [vmem:[%s5620_s4 + $0x180] sm:$0xff] }
 0xac1   :  { %4139 = vmatprep.mubr.msk.bf16.mxu1 %vm78_vm0, %v4963_v31  ;;  %v4396_v31 = vpack.c.bf16 %v2204_v29, %v2203_v24 }
 0xac3   :  { %4397 = vmatprep.subr.bf16.mxu0 %v4396_v31 }
 0xac8   :  { %4140 = vmatmul.mubr.msk.bf16.gmra.mrb[40].mxu1 %vm78_vm0, %v4972_v33  ;;  %v2207_v33 = vld [vmem:[%s5620_s4 + $0x198] sm:$0xff] }
 0xac9   :  { %v4404_v45 = vpack.c.bf16 %v2208_v35, %v2207_v33 }
 0xacb   :  { %4405 = vmatprep.subr.bf16.mxu1 %v4404_v45 }
 0xacc   :  { %4407 = vmatpush3.bf16.msra.mxu1 %v4404_v45 }
 0xacd   :  { %4409 = vmatprep.subr.bf16.mxu1 %v4408_v41 }
 0xad0   :  { %4411 = vmatpush3.bf16.msra.mxu1 %v4408_v41 }
 0xad1   :  { %4235 = vmatprep.subr.bf16.mxu1 %v4638_v57 }
 0xb7b   :  { %v4125_v55 = vpop.f32.mrb[24].mxu1 }
 0xb7c   :  { %v2116_v18 = vpop.f32.mrb[25].mxu1 }
 0xb7d   :  { %v4126_v56 = vpop.f32.mrb[26].mxu1  ;;  %4174 = vmatprep.mubr.msk.f32.mxu0 %vm172_vm2, %v2116_v18 }
 0xb7e   :  { %v2119_v59 = vpop.f32.mrb[27].mxu1 }
 0xb7f   :  { %4175 = vmatmul.mubr.msk.f32.vlgmr.msra.gmra.mrb[48].mxu0 %vm172_vm2, %v2119_v59 }
 0xb80   :  { %4177 = vmatprep.mubr.msk.f32.mxu0 %vm172_vm2, %v4125_v55  ;;  %4399 = vmatpush3.bf16.msra.mxu0 %v4396_v31 }
 0xb81   :  { %4401 = vmatprep.subr.bf16.mxu0 %v4400_v46 }
 0xb83   :  { %v4129_v0 = vpop.f32.mrb[28].mxu1  ;;  %4178 = vmatmul.mubr.msk.f32.gmra.mrb[50].mxu0 %vm172_vm2, %v4126_v56 }
 0xb84   :  { %v2132_v1 = vpop.f32.mrb[29].mxu1  ;;  %4403 = vmatpush3.bf16.msra.mxu0 %v4400_v46 }
 0xb85   :  { %v4130_v2 = vpop.f32.mrb[30].mxu1  ;;  %4180 = vmatprep.mubr.msk.f32.mxu0 %vm172_vm2, %v2132_v1 }
 0xb86   :  { %v2135_v3 = vpop.f32.mrb[31].mxu1 }
 0xb87   :  { %4181 = vmatmul.mubr.msk.f32.gmra.mrb[52].mxu0 %vm172_vm2, %v2135_v3 }
 0xb88   :  { %4183 = vmatprep.mubr.msk.f32.mxu0 %vm172_vm2, %v4129_v0 }
 0xb8b   :  { %v4133_v48 = vpop.f32.mrb[32].mxu1  ;;  %4184 = vmatmul.mubr.msk.f32.gmra.mrb[54].mxu0 %vm172_vm2, %v4130_v2 }
 0xb8c   :  { %v2148_v52 = vpop.f32.mrb[33].mxu1 }
 0xb8d   :  { %v4134_v49 = vpop.f32.mrb[34].mxu1  ;;  %4186 = vmatprep.mubr.msk.f32.mxu0 %vm172_vm2, %v2148_v52 }
 0xb8e   :  { %v2151_v53 = vpop.f32.mrb[35].mxu1 }
 0xb8f   :  { %4187 = vmatmul.mubr.msk.f32.gmra.mrb[56].mxu0 %vm172_vm2, %v2151_v53 }
 0xb90   :  { %4197 = vmatprep.mubr.msk.f32.mxu0 %vm172_vm2, %v4133_v48 }
 0xb93   :  { %v4137_v6 = vpop.f32.mrb[36].mxu1  ;;  %4198 = vmatmul.mubr.msk.f32.vlgmr.msra.gmra.mrb[48].mxu0 %vm172_vm2, %v4134_v49  ;;  %v2693_v49 = vrot.slane %v5402_v8, %v170_v7 }
 0xb94   :  { %v2164_v12 = vpop.f32.mrb[37].mxu1 }
 0xb95   :  { %v4138_v16 = vpop.f32.mrb[38].mxu1  ;;  %4200 = vmatprep.mubr.msk.f32.mxu0 %vm172_vm2, %v2164_v12 }
 0xb96   :  { %v2167_v25 = vpop.f32.mrb[39].mxu1 }
 0xb97   :  { %4201 = vmatmul.mubr.msk.f32.gmra.mrb[50].mxu0 %vm172_vm2, %v2167_v25 }
 0xb98   :  { %4203 = vmatprep.mubr.msk.f32.mxu0 %vm172_vm2, %v4137_v6 }
 0xb9b   :  { %v4141_v60 = vpop.f32.mrb[40].mxu1  ;;  %4204 = vmatmul.mubr.msk.f32.gmra.mrb[52].mxu0 %vm172_vm2, %v4138_v16 }
 0xb9c   :  { %v2180_v28 = vpop.f32.mrb[41].mxu1 }
 0xb9d   :  { %v4142_v44 = vpop.f32.mrb[42].mxu1  ;;  %4206 = vmatprep.mubr.msk.f32.mxu0 %vm172_vm2, %v2180_v28 }
 0xb9e   :  { %v2183_v62 = vpop.f32.mrb[43].mxu1 }
 0xb9f   :  { %4207 = vmatmul.mubr.msk.f32.gmra.mrb[54].mxu0 %vm172_vm2, %v2183_v62 }
 0xba0   :  { %4209 = vmatprep.mubr.msk.f32.mxu0 %vm172_vm2, %v4141_v60 }
 0xba3   :  { %4210 = vmatmul.mubr.msk.f32.gmra.mrb[56].mxu0 %vm172_vm2, %v4142_v44 }
 0xc66   :  { %v4199_v63 = vpop.f32.mrb[48].mxu0 }
 0xc67   :  { %v4464_v21 = vadd.f32 %v4199_v63, %v2359_v10  ;;  %v2621_v17 = vpop.f32.mrb[49].mxu0 }
 0xc68   :  { %v4465_v36 = vadd.f32 %v2621_v17, %v2359_v10 }
 0xc69   :  { %v2681_v61 = vmax.f32 %v4464_v21, 0.0 }
 0xc6a   :  { %v2680_v39 = vmax.f32 %v4465_v36, 0.0  ;;  %v4202_v23 = vpop.f32.mrb[50].mxu0 }
 0xc6b   :  { %v4466_v54 = vadd.f32 %v4202_v23, %v2359_v10  ;;  %v2631_v19 = vpop.f32.mrb[51].mxu0 }
 0xc6c   :  { %v4467_v34 = vadd.f32 %v2631_v19, %v2359_v10  ;;  %4220 = vmatprep.mubr.msk.f32.mxu1 %vm172_vm2, %v2680_v39 }
 0xc6d   :  { %4221 = vmatmul.mubr.msk.f32.vlgmr.msra.gmra.mrb[44].mxu1 %vm172_vm2, %v2681_v61  ;;  %v2683_v31 = vmax.f32 %v4466_v54, 0.0 }
 0xc6e   :  { %v2682_v24 = vmax.f32 %v4467_v34, 0.0  ;;  %v4205_v29 = vpop.f32.mrb[52].mxu0 }
 0xc6f   :  { %v4468_v33 = vadd.f32 %v4205_v29, %v2359_v10  ;;  %v2641_v35 = vpop.f32.mrb[53].mxu0 }
 0xc70   :  { %v4469_v27 = vadd.f32 %v2641_v35, %v2359_v10  ;;  %4223 = vmatprep.mubr.msk.f32.mxu1 %vm172_vm2, %v2682_v24 }
 0xc71   :  { %4224 = vmatmul.mubr.msk.f32.gmra.mrb[46].mxu1 %vm172_vm2, %v2683_v31  ;;  %v2685_v58 = vmax.f32 %v4468_v33, 0.0 }
 0xc72   :  { %v2684_v45 = vmax.f32 %v4469_v27, 0.0  ;;  %v4208_v9 = vpop.f32.mrb[54].mxu0 }
 0xc73   :  { %v4470_v55 = vadd.f32 %v4208_v9, %v2359_v10  ;;  %v2651_v18 = vpop.f32.mrb[55].mxu0 }
 0xc74   :  { %v4471_v56 = vadd.f32 %v2651_v18, %v2359_v10  ;;  %4226 = vmatprep.mubr.msk.f32.mxu1 %vm172_vm2, %v2684_v45 }
 0xc75   :  { %4227 = vmatmul.mubr.msk.f32.gmra.mrb[48].mxu1 %vm172_vm2, %v2685_v58  ;;  %v2687_v0 = vmax.f32 %v4470_v55, 0.0 }
 0xc76   :  { %v2686_v46 = vmax.f32 %v4471_v56, 0.0  ;;  %v4211_v59 = vpop.f32.mrb[56].mxu0 }
 0xc77   :  { %v4472_v1 = vadd.f32 %v4211_v59, %v2359_v10  ;;  %v2661_v2 = vpop.f32.mrb[57].mxu0 }
 0xc78   :  { %v4473_v3 = vadd.f32 %v2661_v2, %v2359_v10  ;;  %4229 = vmatprep.mubr.msk.f32.mxu1 %vm172_vm2, %v2686_v46 }
 0xc79   :  { %4230 = vmatmul.mubr.msk.f32.gmra.mrb[50].mxu1 %vm172_vm2, %v2687_v0  ;;  %v2689_v52 = vmax.f32 %v4472_v1, 0.0 }
 0xc7a   :  { %v2688_v48 = vmax.f32 %v4473_v3, 0.0 }
 0xc7c   :  { %4232 = vmatprep.mubr.msk.f32.mxu1 %vm172_vm2, %v2688_v48 }
 0xc7d   :  { %4233 = vmatmul.mubr.msk.f32.gmra.mrb[52].mxu1 %vm172_vm2, %v2689_v52 }
 0xc7e   :  { %4245 = vmatprep.mubr.msk.bf16.mxu1 %vm4639_vm3, %v4638_v57 }
 0xd40   :  { %v4222_v53 = vpop.f32.mrb[44].mxu1 }
 0xd41   :  { %v2796_v6 = vadd.f32 %v4222_v53, %v2693_v49  ;;  %v2790_v12 = vpop.f32.mrb[45].mxu1 }
 0xd42   :  { %v2791_v16 = vadd.f32 %v2790_v12, %v2693_v49 }
 0xd43   :  { %v2842_v25 = vsel %vm172_vm2, %v2796_v6, 0.0 }
 0xd44   :  { %2843 = vadd.xlane.f32.xlu1 %v2842_v25  ;;  %v4225_v60 = vpop.f32.mrb[46].mxu1  ;;  %v2839_v62 = vsel %vm172_vm2, %v2791_v16, 0.0 }
 0xd45   :  { %v2800_v28 = vpop.f32.mrb[47].mxu1  ;;  %v2806_v44 = vadd.f32 %v4225_v60, %v2693_v49 }
 0xd46   :  { %v2801_v41 = vadd.f32 %v2800_v28, %v2693_v49 }
 0xd47   :  { %v2848_v10 = vsel %vm172_vm2, %v2806_v44, 0.0 }
 0xd48   :  { %v4228_v42 = vpop.f32.mrb[48].mxu1  ;;  %2840 = vadd.xlane.f32.xlu1 %v2839_v62  ;;  %v2845_v17 = vsel %vm172_vm2, %v2801_v41, 0.0 }
 0xd49   :  { %v2810_v4 = vpop.f32.mrb[49].mxu1  ;;  %v2816_v21 = vadd.f32 %v4228_v42, %v2693_v49 }
 0xd4a   :  { %v2811_v23 = vadd.f32 %v2810_v4, %v2693_v49 }
 0xd4b   :  { %v2854_v61 = vsel %vm172_vm2, %v2816_v21, 0.0 }
 0xd4c   :  { %2849 = vadd.xlane.f32.xlu1 %v2848_v10  ;;  %v4231_v7 = vpop.f32.mrb[50].mxu1  ;;  %v2851_v19 = vsel %vm172_vm2, %v2811_v23, 0.0 }
 0xd4d   :  { %v2820_v63 = vpop.f32.mrb[51].mxu1  ;;  %v2826_v54 = vadd.f32 %v4231_v7, %v2693_v49 }
 0xd4e   :  { %v2821_v34 = vadd.f32 %v2820_v63, %v2693_v49 }
 0xd4f   :  { %v2860_v24 = vsel %vm172_vm2, %v2826_v54, 0.0 }
 0xd50   :  { %2846 = vadd.xlane.f32.xlu1 %v2845_v17  ;;  %v4234_v36 = vpop.f32.mrb[52].mxu1  ;;  %v2857_v31 = vsel %vm172_vm2, %v2821_v34, 0.0 }
 0xd51   :  { %v2830_v39 = vpop.f32.mrb[53].mxu1  ;;  %v2836_v33 = vadd.f32 %v4234_v36, %v2693_v49 }
 0xd52   :  { %v2831_v29 = vadd.f32 %v2830_v39, %v2693_v49 }
 0xd53   :  { %v2866_v27 = vsel %vm172_vm2, %v2836_v33, 0.0 }
 0xd54   :  { %2855 = vadd.xlane.f32.xlu1 %v2854_v61  ;;  %v2863_v35 = vsel %vm172_vm2, %v2831_v29, 0.0 }
 0xd58   :  { %2852 = vadd.xlane.f32.xlu1 %v2851_v19 }
 0xd5c   :  { %2861 = vadd.xlane.f32.xlu1 %v2860_v24 }
 0xd60   :  { %2858 = vadd.xlane.f32.xlu1 %v2857_v31 }
 0xd64   :  { %2864 = vadd.xlane.f32.xlu1 %v2863_v35 }
 0xd68   :  { %2867 = vadd.xlane.f32.xlu1 %v2866_v27 }
 0xdd1   :  { %v2844_v45 = vpop.xlane.xlu1 %2843 }
 0xdd2   :  { %v2870_v9 = vmul.f32 0.03125, %v2844_v45 }
 0xdd4   :  { %v5432_v58 = vsub.f32 %v2796_v6, %v2870_v9 }
 0xdd5   :  { %v2841_v55 = vpop.xlane.xlu1 %2840 }
 0xdd6   :  { %v2869_v18 = vmul.f32 0.03125, %v2841_v55  ;;  %v2890_v56 = vmul.f32 %v5432_v58, %v5432_v58 }
 0xdd8   :  { %v5436_v46 = vsub.f32 %v2791_v16, %v2869_v18  ;;  %v2902_v59 = vsel %vm172_vm2, %v2890_v56, 0.0 }
 0xdd9   :  { %v2850_v0 = vpop.xlane.xlu1 %2849  ;;  %2903 = vadd.xlane.f32.xlu1 %v2902_v59 }
 0xdda   :  { %v2872_v1 = vmul.f32 0.03125, %v2850_v0  ;;  %v2889_v2 = vmul.f32 %v5436_v46, %v5436_v46 }
 0xddc   :  { %v5441_v3 = vsub.f32 %v2806_v44, %v2872_v1  ;;  %v2899_v48 = vsel %vm172_vm2, %v2889_v2, 0.0 }
 0xddd   :  { %v2847_v52 = vpop.xlane.xlu1 %2846  ;;  %2900 = vadd.xlane.f32.xlu1 %v2899_v48 }
 0xdde   :  { %v2871_v49 = vmul.f32 0.03125, %v2847_v52  ;;  %v2892_v53 = vmul.f32 %v5441_v3, %v5441_v3 }
 0xde0   :  { %v5446_v6 = vsub.f32 %v2801_v41, %v2871_v49  ;;  %v2908_v12 = vsel %vm172_vm2, %v2892_v53, 0.0 }
 0xde1   :  { %v2856_v16 = vpop.xlane.xlu1 %2855  ;;  %2909 = vadd.xlane.f32.xlu1 %v2908_v12 }
 0xde2   :  { %v2874_v25 = vmul.f32 0.03125, %v2856_v16  ;;  %v2891_v60 = vmul.f32 %v5446_v6, %v5446_v6 }
 0xde4   :  { %v5451_v28 = vsub.f32 %v2816_v21, %v2874_v25  ;;  %v2905_v44 = vsel %vm172_vm2, %v2891_v60, 0.0 }
 0xde5   :  { %2906 = vadd.xlane.f32.xlu0 %v2905_v44  ;;  %v2853_v62 = vpop.xlane.xlu1 %2852 }
 0xde6   :  { %v2873_v42 = vmul.f32 0.03125, %v2853_v62  ;;  %v2894_v4 = vmul.f32 %v5451_v28, %v5451_v28 }
 0xde8   :  { %v5456_v41 = vsub.f32 %v2811_v23, %v2873_v42  ;;  %v2914_v10 = vsel %vm172_vm2, %v2894_v4, 0.0 }
 0xde9   :  { %v2862_v7 = vpop.xlane.xlu1 %2861  ;;  %2915 = vadd.xlane.f32.xlu1 %v2914_v10 }
 0xdea   :  { %v2876_v63 = vmul.f32 0.03125, %v2862_v7  ;;  %v2893_v17 = vmul.f32 %v5456_v41, %v5456_v41 }
 0xdec   :  { %v5461_v21 = vsub.f32 %v2826_v54, %v2876_v63  ;;  %v2911_v36 = vsel %vm172_vm2, %v2893_v17, 0.0 }
 0xded   :  { %v2859_v39 = vpop.xlane.xlu1 %2858  ;;  %2912 = vadd.xlane.f32.xlu1 %v2911_v36 }
 0xdee   :  { %v2875_v61 = vmul.f32 0.03125, %v2859_v39  ;;  %v2896_v19 = vmul.f32 %v5461_v21, %v5461_v21 }
 0xdf0   :  { %v5466_v23 = vsub.f32 %v2821_v34, %v2875_v61  ;;  %v2920_v24 = vsel %vm172_vm2, %v2896_v19, 0.0 }
 0xdf1   :  { %2921 = vadd.xlane.f32.xlu1 %v2920_v24  ;;  %v2865_v31 = vpop.xlane.xlu1 %2864 }
 0xdf2   :  { %v2877_v35 = vmul.f32 0.03125, %v2865_v31  ;;  %v2895_v27 = vmul.f32 %v5466_v23, %v5466_v23 }
 0xdf4   :  { %v5471_v54 = vsub.f32 %v2831_v29, %v2877_v35  ;;  %v2917_v45 = vsel %vm172_vm2, %v2895_v27, 0.0 }
 0xdf5   :  { %2918 = vadd.xlane.f32.xlu0 %v2917_v45  ;;  %v2868_v9 = vpop.xlane.xlu1 %2867 }
 0xdf6   :  { %v2878_v55 = vmul.f32 0.03125, %v2868_v9  ;;  %v2897_v18 = vmul.f32 %v5471_v54, %v5471_v54 }
 0xdf8   :  { %v5476_v34 = vsub.f32 %v2836_v33, %v2878_v55  ;;  %v2923_v56 = vsel %vm172_vm2, %v2897_v18, 0.0 }
 0xdf9   :  { %2924 = vadd.xlane.f32.xlu0 %v2923_v56 }
 0xdfa   :  { %v2898_v59 = vmul.f32 %v5476_v34, %v5476_v34 }
 0xdfc   :  { %v2926_v0 = vsel %vm172_vm2, %v2898_v59, 0.0 }
 0xdfd   :  { %2927 = vadd.xlane.f32.xlu1 %v2926_v0 }
 0xe66   :  { %v2904_v29 = vpop.xlane.xlu1 %2903 }
 0xe67   :  { %v2930_v1 = vmul.f32 0.03125, %v2904_v29 }
 0xe69   :  { %v2940_v2 = vadd.f32 1e-05, %v2930_v1 }
 0xe6a   :  { %v2901_v48 = vpop.xlane.xlu1 %2900 }
 0xe6b   :  { %4584 = vrsqrt.f32 %v2940_v2  ;;  %v2929_v52 = vmul.f32 0.03125, %v2901_v48 }
 0xe6d   :  { %v2939_v49 = vadd.f32 1e-05, %v2929_v52 }
 0xe6e   :  { %v2910_v53 = vpop.xlane.xlu1 %2909 }
 0xe6f   :  { %4586 = vrsqrt.f32 %v2939_v49  ;;  %v2932_v33 = vmul.f32 0.03125, %v2910_v53 }
 0xe71   :  { %v2942_v12 = vadd.f32 1e-05, %v2932_v33 }
 0xe72   :  { %v2907_v16 = vpop.xlane.xlu0 %2906 }
 0xe73   :  { %4588 = vrsqrt.f32 %v2942_v12  ;;  %v2931_v25 = vmul.f32 0.03125, %v2907_v16 }
 0xe75   :  { %v4585_v60 = vpop.eup %4584  ;;  %v2941_v44 = vadd.f32 1e-05, %v2931_v25 }
 0xe76   :  { %v2916_v62 = vpop.xlane.xlu1 %2915  ;;  %v2960_v4 = vmul.f32 %v4585_v60, %v5432_v58 }
 0xe77   :  { %4590 = vrsqrt.f32 %v2941_v44  ;;  %v2934_v42 = vmul.f32 0.03125, %v2916_v62 }
 0xe78   :  { %v2970_v61 = vadd.f32 %v2960_v4, %v5164_v37 }
 0xe79   :  { %v4587_v10 = vpop.eup %4586  ;;  %v2944_v7 = vadd.f32 1e-05, %v2934_v42 }
 0xe7a   :  { %v2913_v63 = vpop.xlane.xlu1 %2912  ;;  %v2959_v17 = vmul.f32 %v4587_v10, %v5436_v46 }
 0xe7b   :  { %4592 = vrsqrt.f32 %v2944_v7  ;;  %v2933_v36 = vmul.f32 0.03125, %v2913_v63  ;;  %v3029_v7 = vld [vmem:[%s5620_s4 + $0x1d8] sm:$0xff]  ;;  %v3031_v63 = vld [vmem:[%s5620_s4 + $0x1e8] sm:$0xff] }
 0xe7c   :  { %v2969_v39 = vadd.f32 %v2959_v17, %v5167_v22  ;;  %v3032_v17 = vld [vmem:[%s5620_s4 + $0x1f0] sm:$0xff] }
 0xe7d   :  { %v4589_v19 = vpop.eup %4588  ;;  %v2943_v24 = vadd.f32 1e-05, %v2933_v36  ;;  %v4424_v36 = vpack.c.bf16 %v3032_v17, %v3031_v63  ;;  %v68_v63 = vld [vmem:[%s5622_s6 + $0x18] sm:$0xff] }
 0xe7e   :  { %v2922_v31 = vpop.xlane.xlu1 %2921  ;;  %v2979_v35 = vpack.c.bf16 %v2970_v61, %v2969_v39  ;;  %v2962_v58 = vmul.f32 %v4589_v19, %v5441_v3  ;;  %v3034_v39 = vld [vmem:[%s5620_s4 + $0x200] sm:$0xff] }
 0xe7f   :  { %4594 = vrsqrt.f32 %v2943_v24  ;;  %v2936_v27 = vmul.f32 0.03125, %v2922_v31 }
 0xe80   :  { %4236 = vmatpush3.bf16.msra.mxu1 %v2979_v35  ;;  %v2972_v18 = vadd.f32 %v2962_v58, %v5174_v38  ;;  %v3036_v58 = vld [vmem:[%s5620_s4 + $0x210] sm:$0xff] }
 0xe81   :  { %v4591_v45 = vpop.eup %4590  ;;  %v2946_v9 = vadd.f32 1e-05, %v2936_v27  ;;  %4237 = vmatprep.subr.bf16.mxu1 %v4638_v57  ;;  %v3035_v27 = vld [vmem:[%s5620_s4 + $0x208] sm:$0xff] }
 0xe82   :  { %v2919_v46 = vpop.xlane.xlu0 %2918  ;;  %v2961_v55 = vmul.f32 %v4591_v45, %v5446_v6  ;;  %v4432_v45 = vpack.c.bf16 %v3036_v58, %v3035_v27 }
 0xe83   :  { %4596 = vrsqrt.f32 %v2946_v9  ;;  %v2935_v22 = vmul.f32 0.03125, %v2919_v46  ;;  %v3121_v9 = vrot.slane %v5402_v8, %v434_v30 }
 0xe84   :  { %v2971_v37 = vadd.f32 %v2961_v55, %v5177_v40 }
 0xe85   :  { %v4593_v56 = vpop.eup %4592  ;;  %v2945_v59 = vadd.f32 1e-05, %v2935_v22 }
 0xe86   :  { %v2925_v0 = vpop.xlane.xlu0 %2924  ;;  %v2980_v29 = vpack.c.bf16 %v2972_v18, %v2971_v37  ;;  %v2964_v3 = vmul.f32 %v4593_v56, %v5451_v28 }
 0xe87   :  { %4598 = vrsqrt.f32 %v2945_v59  ;;  %v2937_v1 = vmul.f32 0.03125, %v2925_v0  ;;  %v3212_v59 = vrot.slane %v5402_v8, %v458_v11 }
 0xe88   :  { %4238 = vmatpush3.bf16.msra.mxu1 %v2980_v29  ;;  %v2974_v49 = vadd.f32 %v2964_v3, %v5185_v5 }
 0xe89   :  { %v4595_v2 = vpop.eup %4594  ;;  %v2947_v48 = vadd.f32 1e-05, %v2937_v1  ;;  %4239 = vmatprep.subr.bf16.mxu1 %v4638_v57 }
 0xe8a   :  { %v2928_v6 = vpop.xlane.xlu1 %2927  ;;  %v2963_v52 = vmul.f32 %v4595_v2, %v5456_v41 }
 0xe8b   :  { %4600 = vrsqrt.f32 %v2947_v48  ;;  %v2938_v40 = vmul.f32 0.03125, %v2928_v6 }
 0xe8c   :  { %v2973_v38 = vadd.f32 %v2963_v52, %v5188_v32 }
 0xe8d   :  { %v4597_v53 = vpop.eup %4596  ;;  %v2948_v33 = vadd.f32 1e-05, %v2938_v40 }
 0xe8e   :  { %v2981_v12 = vpack.c.bf16 %v2974_v49, %v2973_v38  ;;  %v2966_v28 = vmul.f32 %v4597_v53, %v5461_v21  ;;  %v3025_v21 = vld [vmem:[%s5620_s4 + $0x1b8] sm:$0xff] }
 0xe8f   :  { %4602 = vrsqrt.f32 %v2948_v33 }
 0xe90   :  { %4240 = vmatpush3.bf16.msra.mxu1 %v2981_v12  ;;  %v2976_v60 = vadd.f32 %v2966_v28, %v5196_v47  ;;  %v3322_v28 = vld [vmem:[%s5620_s4 + $0x218] sm:$0xff] }
 0xe91   :  { %v4599_v16 = vpop.eup %4598  ;;  %4241 = vmatprep.subr.bf16.mxu1 %v4638_v57 }
 0xe92   :  { %v2965_v25 = vmul.f32 %v4599_v16, %v5466_v23  ;;  %v3323_v16 = vld [vmem:[%s5620_s4 + $0x220] sm:$0xff] }
 0xe94   :  { %v2975_v41 = vadd.f32 %v2965_v25, %v5199_v51  ;;  %v3026_v51 = vld [vmem:[%s5620_s4 + $0x1c0] sm:$0xff]  ;;  %v4436_v25 = vpack.c.bf16 %v3323_v16, %v3322_v28 }
 0xe95   :  { %v4601_v44 = vpop.eup %4600  ;;  %v4412_v4 = vpack.c.bf16 %v3026_v51, %v3025_v21 }
 0xe96   :  { %v2982_v32 = vpack.c.bf16 %v2976_v60, %v2975_v41  ;;  %v2967_v5 = vmul.f32 %v4601_v44, %v5471_v54  ;;  %v3028_v54 = vld [vmem:[%s5620_s4 + $0x1d0] sm:$0xff]  ;;  %v3324_v41 = vld [vmem:[%s5620_s4 + $0x228] sm:$0xff] }
 0xe97   :  { %v3325_v60 = vld [vmem:[%s5620_s4 + $0x230] sm:$0xff] }
 0xe98   :  { %4242 = vmatpush3.bf16.msra.mxu1 %v2982_v32  ;;  %v2977_v47 = vadd.f32 %v2967_v5, %v5216_v43  ;;  %v4440_v44 = vpack.c.bf16 %v3325_v60, %v3324_v41  ;;  %v65_v32 = vld [vmem:[%s5622_s6] sm:$0xff]  ;;  %v66_v5 = vld [vmem:[%s5622_s6 + $0x8] sm:$0xff] }
 0xe99   :  { %v4603_v62 = vpop.eup %4602  ;;  %4243 = vmatprep.subr.bf16.mxu1 %v4638_v57  ;;  %v3027_v57 = vld [vmem:[%s5620_s4 + $0x1c8] sm:$0xff] }
 0xe9a   :  { %v2968_v42 = vmul.f32 %v4603_v62, %v5476_v34  ;;  %v4416_v34 = vpack.c.bf16 %v3028_v54, %v3027_v57  ;;  %v4444_v62 = vpack.c.bf16 %v66_v5, %v65_v32 }
 0xe9c   :  { %v2978_v23 = vadd.f32 %v2968_v42, %v5213_v50  ;;  %v3030_v50 = vld [vmem:[%s5620_s4 + $0x1e0] sm:$0xff] }
 0xe9d   :  { %v4420_v43 = vpack.c.bf16 %v3030_v50, %v3029_v7 }
 0xe9e   :  { %v2983_v10 = vpack.c.bf16 %v2978_v23, %v2977_v47 }
 0xea0   :  { %4244 = vmatpush3.bf16.msra.mxu1 %v2983_v10 }
 0xea1   :  { %4413 = vmatprep.subr.bf16.mxu1 %v4412_v4 }
 0xea3   :  { %4246 = vmatmul.mubr.msk.bf16.vlgmr.msra.gmra.mrb[56].mxu1 %vm1739_vm4, %v5227_v13  ;;  %v3033_v13 = vld [vmem:[%s5620_s4 + $0x1f8] sm:$0xff] }
 0xea4   :  { %4415 = vmatpush3.bf16.msra.mxu1 %v4412_v4  ;;  %4257 = vmatprep.mubr.msk.f32.mxu1 %vm172_vm2, %v5315_v20  ;;  %v4428_v61 = vpack.c.bf16 %v3034_v39, %v3033_v13 }
 0xea5   :  { %4417 = vmatprep.subr.bf16.mxu1 %v4416_v34 }
 0xea6   :  { %4429 = vmatprep.subr.bf16.mxu0 %v4428_v61 }
 0xea7   :  { %4431 = vmatpush3.bf16.msra.mxu0 %v4428_v61 }
 0xea8   :  { %4419 = vmatpush3.bf16.msra.mxu1 %v4416_v34  ;;  %4433 = vmatprep.subr.bf16.mxu0 %v4432_v45 }
 0xea9   :  { %4421 = vmatprep.subr.bf16.mxu1 %v4420_v43 }
 0xeab   :  { %4258 = vmatmul.mubr.msk.f32.vlgmr.msra.gmra.mrb[54].mxu1 %vm172_vm2, %v5318_v15  ;;  %4435 = vmatpush3.bf16.msra.mxu0 %v4432_v45 }
 0xeac   :  { %4423 = vmatpush3.bf16.msra.mxu1 %v4420_v43  ;;  %4437 = vmatprep.subr.bf16.mxu0 %v4436_v25  ;;  %v67_v43 = vld [vmem:[%s5622_s6 + $0x10] sm:$0xff] }
 0xead   :  { %4425 = vmatprep.subr.bf16.mxu1 %v4424_v36  ;;  %v4448_v17 = vpack.c.bf16 %v68_v63, %v67_v43 }
 0xeb0   :  { %4427 = vmatpush3.bf16.msra.mxu1 %v4424_v36 }
 0xeb1   :  { %4445 = vmatprep.subr.bf16.mxu1 %v4444_v62 }
 0xf76   :  { %v3018_v19 = vpop.f32.mrb[56].mxu1 }
 0xf77   :  { %v4247_v24 = vpop.f32.mrb[57].mxu1  ;;  %4268 = vmatprep.mubr.msk.f32.mxu1 %vm172_vm2, %v3018_v19 }
 0xf78   :  { %v3021_v31 = vpop.f32.mrb[58].mxu1  ;;  %v3670_v24 = vld [vmem:[%s5623_s7] ss:$0 sm:$0xff]  ;;  %s4614_s7 = scalar_lea.vmem %s3510_s1, 256 }
 0xf79   :  { %v4248_v35 = vpop.f32.mrb[59].mxu1  ;;  %4269 = vmatmul.mubr.msk.f32.vlgmr.msra.gmra.mrb[54].mxu1 %vm172_vm2, %v3021_v31  ;;  %p4615_p0 = scmp.ne.s32.totalorder %s3510_s1, %s4614_s7  ;;  %p4620_p2 = scmp.lt.s32.totalorder %s4614_s7, %s4614_s7 }
 0xf7a   :  { %4447 = vmatpush3.bf16.msra.mxu1 %v4444_v62 }
 0xf7b   :  { %4449 = vmatprep.subr.bf16.mxu1 %v4448_v17  ;;  %p4621_p3 = por %p4620_p2, %p4619_p1 }
 0xf7d   :  { %p4622_p4 = pnand %p4621_p3, %p4615_p0 }
 0xf7e   :  { %4451 = vmatpush3.bf16.msra.mxu1 %v4448_v17 }
0x104c   :  { %v4270_v46 = vpop.f32.mrb[54].mxu1 }
0x104d   :  { %v4474_v55 = vadd.f32 %v4270_v46, %v3121_v9  ;;  %v3196_v22 = vpop.f32.mrb[55].mxu1 }
0x104e   :  { %v4475_v37 = vadd.f32 %v3196_v22, %v3121_v9 }
0x104f   :  { %v3208_v56 = vmax.f32 %v4474_v55, 0.0 }
0x1050   :  { %v3207_v18 = vmax.f32 %v4475_v37, 0.0 }
0x1052   :  { %4279 = vmatprep.mubr.msk.f32.mxu0 %vm172_vm2, %v3207_v18 }
0x1053   :  { %4280 = vmatmul.mubr.msk.f32.vlgmr.msra.gmra.mrb[58].mxu0 %vm172_vm2, %v3208_v56 }
0x1054   :  { %4439 = vmatpush3.bf16.msra.mxu0 %v4436_v25 }
0x1055   :  { %4441 = vmatprep.subr.bf16.mxu0 %v4440_v44 }
0x1058   :  { %4443 = vmatpush3.bf16.msra.mxu0 %v4440_v44 }
0x1126   :  { %v4281_v0 = vpop.f32.mrb[58].mxu0 }
0x1127   :  { %v3291_v29 = vadd.f32 %v4281_v0, %v3212_v59  ;;  %v3285_v1 = vpop.f32.mrb[59].mxu0 }
0x1128   :  { %v3286_v3 = vadd.f32 %v3285_v1, %v3212_v59 }
0x1129   :  { %v3297_v30 = vsel %vm172_vm2, %v3291_v29, 0.0 }
0x112a   :  { %3298 = vadd.xlane.f32.xlu1 %v3297_v30  ;;  %v3294_v2 = vsel %vm172_vm2, %v3286_v3, 0.0 }
0x112b   :  { %3295 = vadd.xlane.f32.xlu0 %v3294_v2 }
0x11b7   :  { %v3299_v48 = vpop.xlane.xlu1 %3298 }
0x11b8   :  { %v3301_v6 = vmul.f32 0.03125, %v3299_v48  ;;  %v3296_v52 = vpop.xlane.xlu0 %3295 }
0x11b9   :  { %v3300_v40 = vmul.f32 0.03125, %v3296_v52 }
0x11ba   :  { %v3303_v38 = vsub.f32 %v3291_v29, %v3301_v6 }
0x11bb   :  { %v3302_v49 = vsub.f32 %v3286_v3, %v3300_v40 }
0x11bc   :  { %v3305_v53 = vmul.f32 %v3303_v38, %v3303_v38 }
0x11bd   :  { %v3304_v33 = vmul.f32 %v3302_v49, %v3302_v49 }
0x11be   :  { %v3309_v11 = vsel %vm172_vm2, %v3305_v53, 0.0 }
0x11bf   :  { %3310 = vadd.xlane.f32.xlu1 %v3309_v11  ;;  %v3306_v12 = vsel %vm172_vm2, %v3304_v33, 0.0 }
0x11c0   :  { %3307 = vadd.xlane.f32.xlu0 %v3306_v12 }
0x124c   :  { %v3311_v42 = vpop.xlane.xlu1 %3310 }
0x124d   :  { %v3313_v21 = vmul.f32 0.03125, %v3311_v42  ;;  %v3308_v51 = vpop.xlane.xlu0 %3307 }
0x124e   :  { %v3312_v47 = vmul.f32 0.03125, %v3308_v51 }
0x124f   :  { %v3315_v23 = vadd.f32 1e-05, %v3313_v21 }
0x1250   :  { %v3314_v4 = vadd.f32 1e-05, %v3312_v47 }
0x1251   :  { %4604 = vrsqrt.f32 %v3315_v23 }
0x1252   :  { %4606 = vrsqrt.f32 %v3314_v4 }
0x125b   :  { %v4605_v10 = vpop.eup %4604 }
0x125c   :  { %v4607_v57 = vpop.eup %4606  ;;  %v3319_v54 = vmul.f32 %v4605_v10, %v3303_v38 }
0x125d   :  { %v3318_v34 = vmul.f32 %v4607_v57, %v3302_v49 }
0x125e   :  { %v3321_v50 = vadd.f32 %v3319_v54, %v5318_v15 }
0x125f   :  { %v3320_v7 = vadd.f32 %v3318_v34, %v5315_v20  ;;  %v3329_v20 = vrot.slane %v5402_v8, %v1092_v14  ;;  %v43_v8 = vld [vmem:[%s5618_s2] sm:$0xff] }
0x1261   :  { %4290 = vmatprep.mubr.msk.f32.mxu0 %vm172_vm2, %v3320_v7 }
0x1262   :  { %4291 = vmatmul.mubr.msk.f32.vlgmr.msra.gmra.mrb[60].mxu0 %vm172_vm2, %v3321_v50 }
0x1335   :  { %v4292_v15 = vpop.f32.mrb[60].mxu0 }
0x1336   :  { %v3408_v36 = vadd.f32 %v4292_v15, %v3329_v20  ;;  %v3402_v13 = vpop.f32.mrb[61].mxu0 }
0x1337   :  { %v3403_v39 = vadd.f32 %v3402_v13, %v3329_v20 }
0x1338   :  { %v3412_v19 = vmax.f32 %v3408_v36, 0.0 }
0x1339   :  { %v3411_v61 = vmax.f32 %v3403_v39, 0.0 }
0x133b   :  { %4301 = vmatprep.mubr.msk.f32.mxu1 %vm172_vm2, %v3411_v61 }
0x133c   :  { %4302 = vmatmul.mubr.msk.f32.vlgmr.msra.gmra.mrb[60].mxu1 %vm172_vm2, %v3412_v19 }
0x140f   :  { %v4303_v31 = vpop.f32.mrb[60].mxu1 }
0x1410   :  { %v3497_v14 = vadd.f32 %v4303_v31, %v3670_v24  ;;  %v3491_v35 = vpop.f32.mrb[61].mxu1 }
0x1411   :  { %v3492_v27 = vadd.f32 %v3670_v24, %v3491_v35 }
0x1412   :  { %v3501_v58 = vadd.f32 %v3497_v14, %v44_v26 }
0x1413   :  { %v3500_v45 = vadd.f32 %v3492_v27, %v43_v8 }
0x1414   :  { %3503 = vst [vmem:[#allocation2 + $0x8] sm:$0xff] %v3501_v58 }
0x1415   :  { %3502 = vst [vmem:[#allocation2] sm:$0xff] %v3500_v45 }
0x1416   :  { %4625 = shalt.err (!%p4622_p4)
}
0x1417   :  { %s4626_s2 = scalar_lea.hbm %s5624_s8, 256 }
0x1418   :  { %p4627_p5 = scmp.ne.s32.totalorder %s5624_s8, %s4626_s2  ;;  %p4630_p6 = scmp.lt.u32.totalorder %s4626_s2, %s5624_s8 }
0x141a   :  { %p4632_p7 = pnand %p4630_p6, %p4627_p5 }
0x141c   :  { %4635 = shalt.err (!%p4632_p7)
}
0x141d   :  { %s4641_s5 = smov 128   ;;  %s4642_s29 = smov 8  }
0x141e   :  { %3515 = dma.vmem_to_hbm [thread:$0]  %s3510_s1, 256, %s5624_s8, [#allocation3], %s4641_s5, %s4641_s5, %s4642_s29  }
0x141f   :  { %4636 = dma.done.wait [#allocation3], 256  }
0x1420   :  { %4637 = vsyncadd [#allocation3], 4294967040 }
0x1421   :  { %3519 = vsyncpa [#allocation3], 1 }

</bundles_post_ra>
